<compile_context>
chip_gen: v6e
topology: v6e:2x2x1
jax: 0.10.0
libtpu: 0.0.40
codegen_flags: <defaults>
</compile_context>

<pallas_src>
import functools

import jax
import jax.numpy as jnp
import numpy as np
from jax.experimental import pallas as pl
from jax.experimental.pallas import tpu as pltpu

MATMUL_DTYPE = jnp.bfloat16  # MXU-native input dtype; accumulation stays f32.


def _relu_conv_relu_kernel(x_ref, w_ref, b_ref, o_ref, *, H, W, Cin, Cout):
    """Overlapping-rows 3x3 conv on a pre-ReLU'd, pre-padded, flattened slab.

    x_ref : (1, P, Cin) bf16.  Row r = y*(W+2) + x of the zero-halo padded,
            already-ReLU'd image in raster order; P >= (H+2)*(W+2) + 2 so
            every tap's M-long slice stays in bounds.
    w_ref : (9*Cin, Cout) bf16, tap-major (kh, kw) then cin.
    b_ref : (1, Cout) f32 bias.
    o_ref : (1, H*(W+2), Cout).  Flat output rows; rows whose x-coord >= W are
            garbage ("wrap" columns) and are discarded by the wrapper.
    """
    Wp = W + 2
    M = H * Wp  # flat output rows per image (incl. 2 wrap columns per row)

    acc = None
    for kh in range(3):
        for kw in range(3):
            t = kh * 3 + kw
            # Pure sublane-offset slice of the padded raster slab: for flat
            # output row r = h*(W+2)+w this reads padded pixel (h+kh, w+kw).
            lhs = x_ref[0, pl.ds(kh * Wp + kw, M), :]           # (M, Cin)
            rhs = w_ref[pl.ds(t * Cin, Cin), :]                 # (Cin, Cout)
            part = jnp.dot(lhs, rhs, preferred_element_type=jnp.float32)
            acc = part if acc is None else acc + part           # vreg accum

    out = jnp.maximum(acc + b_ref[...], 0.0)                    # bias + relu1
    o_ref[0] = out.astype(o_ref.dtype)


@jax.jit
def relu_conv2d_relu(x_nchw, w, b):
    """x_nchw: (N, Cin, H, W); w: (Cout, Cin, 3, 3); b: (Cout,)."""
    N, Cin, H, W = x_nchw.shape
    Cout = w.shape[0]
    Wp = W + 2
    M = H * Wp                 # accumulator / flat-output rows per image
    P = (H + 3) * Wp           # padded-slab rows per image; the extra bottom
                               # row keeps the last tap's M-long slice in bounds

    # ReLU + bf16 cast + zero halo fused into the NCHW->NHWC layout pass.
    x = jnp.transpose(x_nchw, (0, 2, 3, 1))                    # NHWC
    x = jnp.maximum(x, 0).astype(MATMUL_DTYPE)                 # hoisted relu0
    x = jnp.pad(x, ((0, 0), (1, 2), (1, 1), (0, 0)))           # halo (+1 spare row)
    x = x.reshape(N, P, Cin)                                   # flat raster (free)

    # (Cout, Cin, 3, 3) -> (kh, kw, Cin, Cout) -> (9*Cin, Cout), tap-major.
    w_taps = (jnp.transpose(w, (2, 3, 1, 0))
              .reshape(9 * Cin, Cout).astype(MATMUL_DTYPE))
    b2d = b.reshape(1, Cout).astype(jnp.float32)

    # Fail-fast VMEM estimate: double-buffered in/out blocks + weights + live
    # accumulator + one LHS slice.
    est_vmem = (2 * P * Cin * 2 + 2 * M * Cout * 4
                + 2 * 9 * Cin * Cout * 2 + M * Cout * 4 + M * Cin * 2)
    assert est_vmem < 48 * 1024 * 1024, (
        "whole-image block no longer fits VMEM; H-tile with a 1-row halo")

    kernel = functools.partial(_relu_conv_relu_kernel,
                               H=H, W=W, Cin=Cin, Cout=Cout)

    out_flat = pl.pallas_call(
        kernel,
        out_shape=jax.ShapeDtypeStruct((N, M, Cout), x_nchw.dtype),
        grid_spec=pltpu.PrefetchScalarGridSpec(
            num_scalar_prefetch=0,
            grid=(N,),
            in_specs=[
                pl.BlockSpec((1, P, Cin), lambda n: (n, 0, 0)),
                pl.BlockSpec((9 * Cin, Cout), lambda n: (0, 0)),
                pl.BlockSpec((1, Cout), lambda n: (0, 0)),
            ],
            out_specs=pl.BlockSpec((1, M, Cout), lambda n: (n, 0, 0)),
        ),
        compiler_params=pltpu.CompilerParams(
            dimension_semantics=("parallel",)),
    )(x, w_taps, b2d)

    # Drop the 2 wrap columns per row; back to NCHW.  The reshape is a free
    # bitcast; the slice + transpose fuse into one XLA pass.
    out = out_flat.reshape(N, H, Wp, Cout)[:, :, :W, :]
    return jnp.transpose(out, (0, 3, 1, 2))


def _reference(x_nchw, w, b):
    """Pure-JAX f32 reference: relu -> conv2d(pad=1) -> bias -> relu, NCHW."""
    x = jnp.maximum(x_nchw, 0.0)
    y = jax.lax.conv_general_dilated(
        x, w, window_strides=(1, 1), padding=((1, 1), (1, 1)),
        dimension_numbers=("NCHW", "OIHW", "NCHW"))
    y = y + b.reshape(1, -1, 1, 1)
    return jnp.maximum(y, 0.0)


if __name__ == "__main__":
    # Small shapes consistent with the module: Conv2d(64, 64, 3x3, pad=1).
    N, C, H, W = 2, 64, 16, 16
    key = jax.random.PRNGKey(0)
    kx, kw, kb = jax.random.split(key, 3)

    x = jax.random.normal(kx, (N, C, H, W), dtype=jnp.float32)

    # Deterministic PyTorch-like init for Conv2d(64, 64, 3, 3).
    fan_in = C * 3 * 3
    bound = 1.0 / np.sqrt(fan_in)
    w = jax.random.uniform(kw, (64, 64, 3, 3), minval=-bound, maxval=bound,
                           dtype=jnp.float32)
    b = jax.random.uniform(kb, (64,), minval=-bound, maxval=bound,
                           dtype=jnp.float32)

    out = relu_conv2d_relu(x, w, b)
    out = jax.block_until_ready(out)

    ref = jax.block_until_ready(_reference(x, w, b))
    # bf16 matmul inputs (f32 accumulation) -> loosened tolerance vs f32 ref.
    np.testing.assert_allclose(np.asarray(out), np.asarray(ref),
                               rtol=2e-2, atol=2e-2)

    print("KERNEL_OK")
</pallas_src>

<mosaic_0001>
module attributes {stable_mosaic.version = 11 : i64} {
  func.func @_relu_conv_relu_kernel(%arg0: i32, %arg1: memref<1x342x64xbf16, #tpu.memory_space<vmem>>, %arg2: memref<576x64xbf16, #tpu.memory_space<vmem>>, %arg3: memref<1x64xf32, #tpu.memory_space<vmem>>, %arg4: memref<1x288x64xf32, #tpu.memory_space<vmem>>) attributes {dimension_semantics = [#tpu.dimension_semantics<parallel>], iteration_bounds = array<i64: 2>, scalar_prefetch = 0 : i64, scratch_operands = 0 : i64, tpu.core_type = #tpu.core_type<tc>, window_params = [{transform_indices = @transform_0, window_bounds = array<i64: 1, 342, 64>}, {pipeline_mode = #tpu.pipeline_mode<synchronous>, transform_indices = @transform_1, window_bounds = array<i64: 576, 64>}, {pipeline_mode = #tpu.pipeline_mode<synchronous>, transform_indices = @transform_2, window_bounds = array<i64: 1, 64>}, {transform_indices = @transform_3, window_bounds = array<i64: 1, 288, 64>}]} {
    %c0 = arith.constant 0 : index
    %c0_0 = arith.constant 0 : index
    %c0_1 = arith.constant 0 : index
    %0 = vector.load %arg1[%c0, %c0_0, %c0_1] : memref<1x342x64xbf16, #tpu.memory_space<vmem>>, vector<1x288x64xbf16>
    %1 = vector.shape_cast %0 : vector<1x288x64xbf16> to vector<288x64xbf16>
    %c0_2 = arith.constant 0 : index
    %c0_3 = arith.constant 0 : index
    %2 = vector.load %arg2[%c0_2, %c0_3] : memref<576x64xbf16, #tpu.memory_space<vmem>>, vector<64x64xbf16>
    %cst = arith.constant dense<0.000000e+00> : vector<288x64xf32>
    %3 = tpu.matmul %1, %2, %cst {dimension_numbers = #tpu.dot_dimension_numbers<[1], [0], [0], [1], [0, 0, 1, 1], [], []>} : vector<288x64xbf16>, vector<64x64xbf16>, vector<288x64xf32> -> vector<288x64xf32>
    %c0_4 = arith.constant 0 : index
    %c1 = arith.constant 1 : index
    %c0_5 = arith.constant 0 : index
    %4 = vector.load %arg1[%c0_4, %c1, %c0_5] : memref<1x342x64xbf16, #tpu.memory_space<vmem>>, vector<1x288x64xbf16>
    %5 = vector.shape_cast %4 : vector<1x288x64xbf16> to vector<288x64xbf16>
    %c64 = arith.constant 64 : index
    %c0_6 = arith.constant 0 : index
    %6 = vector.load %arg2[%c64, %c0_6] : memref<576x64xbf16, #tpu.memory_space<vmem>>, vector<64x64xbf16>
    %cst_7 = arith.constant dense<0.000000e+00> : vector<288x64xf32>
    %7 = tpu.matmul %5, %6, %cst_7 {dimension_numbers = #tpu.dot_dimension_numbers<[1], [0], [0], [1], [0, 0, 1, 1], [], []>} : vector<288x64xbf16>, vector<64x64xbf16>, vector<288x64xf32> -> vector<288x64xf32>
    %8 = arith.addf %3, %7 : vector<288x64xf32>
    %c0_8 = arith.constant 0 : index
    %c2 = arith.constant 2 : index
    %c0_9 = arith.constant 0 : index
    %9 = vector.load %arg1[%c0_8, %c2, %c0_9] : memref<1x342x64xbf16, #tpu.memory_space<vmem>>, vector<1x288x64xbf16>
    %10 = vector.shape_cast %9 : vector<1x288x64xbf16> to vector<288x64xbf16>
    %c128 = arith.constant 128 : index
    %c0_10 = arith.constant 0 : index
    %11 = vector.load %arg2[%c128, %c0_10] : memref<576x64xbf16, #tpu.memory_space<vmem>>, vector<64x64xbf16>
    %cst_11 = arith.constant dense<0.000000e+00> : vector<288x64xf32>
    %12 = tpu.matmul %10, %11, %cst_11 {dimension_numbers = #tpu.dot_dimension_numbers<[1], [0], [0], [1], [0, 0, 1, 1], [], []>} : vector<288x64xbf16>, vector<64x64xbf16>, vector<288x64xf32> -> vector<288x64xf32>
    %13 = arith.addf %8, %12 : vector<288x64xf32>
    %c0_12 = arith.constant 0 : index
    %c18 = arith.constant 18 : index
    %c0_13 = arith.constant 0 : index
    %14 = vector.load %arg1[%c0_12, %c18, %c0_13] : memref<1x342x64xbf16, #tpu.memory_space<vmem>>, vector<1x288x64xbf16>
    %15 = vector.shape_cast %14 : vector<1x288x64xbf16> to vector<288x64xbf16>
    %c192 = arith.constant 192 : index
    %c0_14 = arith.constant 0 : index
    %16 = vector.load %arg2[%c192, %c0_14] : memref<576x64xbf16, #tpu.memory_space<vmem>>, vector<64x64xbf16>
    %cst_15 = arith.constant dense<0.000000e+00> : vector<288x64xf32>
    %17 = tpu.matmul %15, %16, %cst_15 {dimension_numbers = #tpu.dot_dimension_numbers<[1], [0], [0], [1], [0, 0, 1, 1], [], []>} : vector<288x64xbf16>, vector<64x64xbf16>, vector<288x64xf32> -> vector<288x64xf32>
    %18 = arith.addf %13, %17 : vector<288x64xf32>
    %c0_16 = arith.constant 0 : index
    %c19 = arith.constant 19 : index
    %c0_17 = arith.constant 0 : index
    %19 = vector.load %arg1[%c0_16, %c19, %c0_17] : memref<1x342x64xbf16, #tpu.memory_space<vmem>>, vector<1x288x64xbf16>
    %20 = vector.shape_cast %19 : vector<1x288x64xbf16> to vector<288x64xbf16>
    %c256 = arith.constant 256 : index
    %c0_18 = arith.constant 0 : index
    %21 = vector.load %arg2[%c256, %c0_18] : memref<576x64xbf16, #tpu.memory_space<vmem>>, vector<64x64xbf16>
    %cst_19 = arith.constant dense<0.000000e+00> : vector<288x64xf32>
    %22 = tpu.matmul %20, %21, %cst_19 {dimension_numbers = #tpu.dot_dimension_numbers<[1], [0], [0], [1], [0, 0, 1, 1], [], []>} : vector<288x64xbf16>, vector<64x64xbf16>, vector<288x64xf32> -> vector<288x64xf32>
    %23 = arith.addf %18, %22 : vector<288x64xf32>
    %c0_20 = arith.constant 0 : index
    %c20 = arith.constant 20 : index
    %c0_21 = arith.constant 0 : index
    %24 = vector.load %arg1[%c0_20, %c20, %c0_21] : memref<1x342x64xbf16, #tpu.memory_space<vmem>>, vector<1x288x64xbf16>
    %25 = vector.shape_cast %24 : vector<1x288x64xbf16> to vector<288x64xbf16>
    %c320 = arith.constant 320 : index
    %c0_22 = arith.constant 0 : index
    %26 = vector.load %arg2[%c320, %c0_22] : memref<576x64xbf16, #tpu.memory_space<vmem>>, vector<64x64xbf16>
    %cst_23 = arith.constant dense<0.000000e+00> : vector<288x64xf32>
    %27 = tpu.matmul %25, %26, %cst_23 {dimension_numbers = #tpu.dot_dimension_numbers<[1], [0], [0], [1], [0, 0, 1, 1], [], []>} : vector<288x64xbf16>, vector<64x64xbf16>, vector<288x64xf32> -> vector<288x64xf32>
    %28 = arith.addf %23, %27 : vector<288x64xf32>
    %c0_24 = arith.constant 0 : index
    %c36 = arith.constant 36 : index
    %c0_25 = arith.constant 0 : index
    %29 = vector.load %arg1[%c0_24, %c36, %c0_25] : memref<1x342x64xbf16, #tpu.memory_space<vmem>>, vector<1x288x64xbf16>
    %30 = vector.shape_cast %29 : vector<1x288x64xbf16> to vector<288x64xbf16>
    %c384 = arith.constant 384 : index
    %c0_26 = arith.constant 0 : index
    %31 = vector.load %arg2[%c384, %c0_26] : memref<576x64xbf16, #tpu.memory_space<vmem>>, vector<64x64xbf16>
    %cst_27 = arith.constant dense<0.000000e+00> : vector<288x64xf32>
    %32 = tpu.matmul %30, %31, %cst_27 {dimension_numbers = #tpu.dot_dimension_numbers<[1], [0], [0], [1], [0, 0, 1, 1], [], []>} : vector<288x64xbf16>, vector<64x64xbf16>, vector<288x64xf32> -> vector<288x64xf32>
    %33 = arith.addf %28, %32 : vector<288x64xf32>
    %c0_28 = arith.constant 0 : index
    %c37 = arith.constant 37 : index
    %c0_29 = arith.constant 0 : index
    %34 = vector.load %arg1[%c0_28, %c37, %c0_29] : memref<1x342x64xbf16, #tpu.memory_space<vmem>>, vector<1x288x64xbf16>
    %35 = vector.shape_cast %34 : vector<1x288x64xbf16> to vector<288x64xbf16>
    %c448 = arith.constant 448 : index
    %c0_30 = arith.constant 0 : index
    %36 = vector.load %arg2[%c448, %c0_30] : memref<576x64xbf16, #tpu.memory_space<vmem>>, vector<64x64xbf16>
    %cst_31 = arith.constant dense<0.000000e+00> : vector<288x64xf32>
    %37 = tpu.matmul %35, %36, %cst_31 {dimension_numbers = #tpu.dot_dimension_numbers<[1], [0], [0], [1], [0, 0, 1, 1], [], []>} : vector<288x64xbf16>, vector<64x64xbf16>, vector<288x64xf32> -> vector<288x64xf32>
    %38 = arith.addf %33, %37 : vector<288x64xf32>
    %c0_32 = arith.constant 0 : index
    %c38 = arith.constant 38 : index
    %c0_33 = arith.constant 0 : index
    %39 = vector.load %arg1[%c0_32, %c38, %c0_33] : memref<1x342x64xbf16, #tpu.memory_space<vmem>>, vector<1x288x64xbf16>
    %40 = vector.shape_cast %39 : vector<1x288x64xbf16> to vector<288x64xbf16>
    %c512 = arith.constant 512 : index
    %c0_34 = arith.constant 0 : index
    %41 = vector.load %arg2[%c512, %c0_34] : memref<576x64xbf16, #tpu.memory_space<vmem>>, vector<64x64xbf16>
    %cst_35 = arith.constant dense<0.000000e+00> : vector<288x64xf32>
    %42 = tpu.matmul %40, %41, %cst_35 {dimension_numbers = #tpu.dot_dimension_numbers<[1], [0], [0], [1], [0, 0, 1, 1], [], []>} : vector<288x64xbf16>, vector<64x64xbf16>, vector<288x64xf32> -> vector<288x64xf32>
    %43 = arith.addf %38, %42 : vector<288x64xf32>
    %c0_36 = arith.constant 0 : index
    %c0_37 = arith.constant 0 : index
    %44 = vector.load %arg3[%c0_36, %c0_37] : memref<1x64xf32, #tpu.memory_space<vmem>>, vector<1x64xf32>
    %45 = vector.broadcast %44 : vector<1x64xf32> to vector<288x64xf32>
    %46 = arith.addf %43, %45 : vector<288x64xf32>
    %cst_38 = arith.constant 0.000000e+00 : f32
    %47 = vector.broadcast %cst_38 : f32 to vector<288x64xf32>
    %48 = arith.maximumf %46, %47 : vector<288x64xf32>
    %c0_39 = arith.constant 0 : index
    %c0_40 = arith.constant 0 : index
    %c0_41 = arith.constant 0 : index
    %49 = vector.load %arg4[%c0_39, %c0_40, %c0_41] : memref<1x288x64xf32, #tpu.memory_space<vmem>>, vector<1x288x64xf32>
    %50 = vector.shape_cast %49 : vector<1x288x64xf32> to vector<288x64xf32>
    %51 = vector.shape_cast %48 : vector<288x64xf32> to vector<1x288x64xf32>
    tpu.vector_store %arg4[%c0_39, %c0_40, %c0_41], %51 {strides = array<i32>} : memref<1x288x64xf32, #tpu.memory_space<vmem>>, vector<1x288x64xf32>,
    return
  }
  func.func @transform_0(%arg0: i32) -> (i32, i32, i32) {
    %c0_i32 = arith.constant 0 : i32
    %c0_i32_0 = arith.constant 0 : i32
    %c0_i32_1 = arith.constant 0 : i32
    return %arg0, %c0_i32, %c0_i32_0 : i32, i32, i32
  }
  func.func @transform_1(%arg0: i32) -> (i32, i32) {
    %c0_i32 = arith.constant 0 : i32
    %c0_i32_0 = arith.constant 0 : i32
    %c0_i32_1 = arith.constant 0 : i32
    return %c0_i32, %c0_i32_0 : i32, i32
  }
  func.func @transform_2(%arg0: i32) -> (i32, i32) {
    %c0_i32 = arith.constant 0 : i32
    %c0_i32_0 = arith.constant 0 : i32
    %c0_i32_1 = arith.constant 0 : i32
    return %c0_i32, %c0_i32_0 : i32, i32
  }
  func.func @transform_3(%arg0: i32) -> (i32, i32, i32) {
    %c0_i32 = arith.constant 0 : i32
    %c0_i32_0 = arith.constant 0 : i32
    %c0_i32_1 = arith.constant 0 : i32
    return %arg0, %c0_i32, %c0_i32_0 : i32, i32, i32
  }
}

</mosaic_0001>

<bundles_post_ra>
// kernel: relu_conv2d_relu.1
= control target key start
LH: loop header
LB: loop body
LE: loop exit
PB: predicated region body
PF: predicated region fallthrough
CT: control target
= control target key end

     0   :  { %s5041_s12 = smov 0   ;;  %s6527_s0 = inlined_call_operand.vmem [shape: bf16[2,342,64], index: 0, kind: input, shape index: {}]   ;;  %s6528_s1 = inlined_call_operand.vmem [shape: bf16[576,64], index: 1, kind: input, shape index: {}]   ;;  %s6529_s2 = inlined_call_operand.vmem [shape: f32[1,64], index: 2, kind: input, shape index: {}]   ;;  %s6530_s3 = inlined_call_operand.vmem [shape: f32[2,288,64], index: 3, kind: output, shape index: {}]  }
   0x1 LB: > { %s4033_s13 = sadd.s32 4294967295, %s5019_s12   ;;  %p4037_p0 = scmp.ge.s32.totalorder %s5019_s12, 1  ;;  %s5019_s12 = sphi %s5041_s12, %s13_s12  }
   0x2   : > { %p137_p1 = scmp.lt.s32.totalorder %s5019_s12, 3 }
   0x4   : > { %p138_p2 = pnand %p4037_p0, %p137_p1 }
   0x6   : > { %141 = sbr.rel (%p138_p2) target bundleno = 554 (0x22a), region = 32 }
   0xb   : > { %v4915_v0 = vld [vmem:[%s6528_s1 + $0x38] sm:$0xff]   ;;  %p161_p3 = scmp.lt.s32.totalorder %s4033_s13, 1  ;;  %v4916_v1 = vld [vmem:[%s6528_s1 + $0x30] sm:$0xff]   ;;  %v4917_v2 = vld [vmem:[%s6528_s1 + $0x28] sm:$0xff]   ;;  %vm318_vm0 = vsmask.f32 7424 }
   0xc   : > { %4501 = vmatprep.subr.bf16.mxu0 %v4915_v0  ;;  %4897 = vmatprep.subr.bf16.mxu1 %v4915_v0  ;;  %v4918_v3 = vld [vmem:[%s6528_s1 + $0x20] sm:$0xff]   ;;  %v4925_v14 = vld [vmem:[%s6528_s1 + $0x58] sm:$0xff]   ;;  %vm491_vm1 = vcmask 523264   ;;  %v4931_v48 = vld [vmem:[%s6528_s1 + $0x50] sm:$0xff]   ;;  %vm972_vm2 = vcmask 1046528   ;;  %vm2253_vm3 = vcmask 1045504  }
   0xd   : > { %s6574_s13 = smov (!%p161_p3, %s4033_s13), 1  ;;  %4502 = vmatpush3.bf16.msra.mxu0 %v4915_v0  ;;  %4901 = vmatpush3.bf16.msra.mxu1 %v4915_v0  ;;  %v4926_v15 = vld [vmem:[%s6528_s1 + $0x18] sm:$0xff]   ;;  %v4932_v57 = vld [vmem:[%s6528_s1 + $0x10] sm:$0xff]   ;;  %vm1779_vm4 = vsmask.f32 6400  ;;  %vm3534_vm5 = vcmask 1044480  }
   0xe   : > { %4503 = vmatprep.subr.bf16.mxu0 %v4916_v1  ;;  %4898 = vmatprep.subr.bf16.mxu1 %v4916_v1  ;;  %s4905_s20 = smul.u32 172, %s6574_s13  ;;  %vm3060_vm6 = vsmask.f32 5376 }
  0x10   : > { %s5067_s25 = scalar_lea.vmem %s6527_s0, %s4905_s20 }
  0x11   : > { %4504 = vmatpush3.bf16.msra.mxu0 %v4916_v1  ;;  %4902 = vmatpush3.bf16.msra.mxu1 %v4916_v1  ;;  %v172_v4 = vld [vmem:[%s5067_s25] sm:$0xf]  ;;  %v5071_v5 = vld [vmem:[%s5067_s25 + $0x4] sm:$0xf]  ;;  %v5077_v7 = vld [vmem:[%s5067_s25 + $0x8] sm:$0xff]  }
  0x12   : > { %4505 = vmatprep.subr.bf16.mxu0 %v4917_v2  ;;  %4899 = vmatprep.subr.bf16.mxu1 %v4917_v2  ;;  %v5074_v6 = vcombine.low %v172_v4, %v5071_v5  ;;  %v327_v10 = vshll.u32 %v5077_v7, 16  ;;  %v331_v11 = vshrl.u32 %v5077_v7, 16  ;;  %v5084_v12 = vld [vmem:[%s5067_s25 + $0x50] sm:$0xff]   ;;  %v5087_v13 = vld [vmem:[%s5067_s25 + $0x58] sm:$0xff]   ;;  %v5104_v24 = vld [vmem:[%s5067_s25 + $0x60] sm:$0xff]  }
  0x13   : > { %v5096_v16 = vld [vmem:[%s5067_s25 + $0x10] sm:$0xff]   ;;  %v399_v19 = vshll.u32 %v5084_v12, 16  ;;  %v403_v20 = vshrl.u32 %v5084_v12, 16  ;;  %v407_v21 = vshll.u32 %v5087_v13, 16  ;;  %v411_v22 = vshrl.u32 %v5087_v13, 16  ;;  %v5109_v28 = vld [vmem:[%s5067_s25 + $0x18] sm:$0xff]  }
  0x14   : > { %v320_v8 = vshrl.u32 %v5074_v6, 16  ;;  %v322_v9 = vshll.u32 %v5074_v6, 16  ;;  %v329_v18 = vrot.slane %v327_v10, 1  ;;  %v335_v23 = vshll.u32 %v5096_v16, 16  ;;  %v5117_v36 = vld [vmem:[%s5067_s25 + $0x68] sm:$0xff]   ;;  %v5121_v38 = vld [vmem:[%s5067_s25 + $0x20] sm:$0xff]  }
  0x15   : > { %4506 = vmatpush3.bf16.msra.mxu0 %v4917_v2  ;;  %4903 = vmatpush3.bf16.msra.mxu1 %v4917_v2  ;;  %v5106_v27 = vrot.slane %v399_v19, 1  ;;  %v409_v29 = vrot.slane %v407_v21, 1  ;;  %v415_v31 = vshll.u32 %v5104_v24, 16  ;;  %v339_v32 = vshrl.u32 %v5096_v16, 16  ;;  %v5126_v43 = vld [vmem:[%s5067_s25 + $0x70] sm:$0xff]   ;;  %v5146_v58 = vld [vmem:[%s5067_s25 + $0x28] sm:$0xff]  }
  0x16   : > { %4507 = vmatprep.subr.bf16.mxu0 %v4918_v3  ;;  %4900 = vmatprep.subr.bf16.mxu1 %v4918_v3  ;;  %v324_v17 = vrot.slane %v322_v9, 1  ;;  %v333_v26 = vor.u32 %v331_v11, %v329_v18  ;;  %v337_v30 = vrot.slane %v335_v23, 1  ;;  %v343_v35 = vshll.u32 %v5109_v28, 16  ;;  %v5159_v9 = vld [vmem:[%s5067_s25 + $0x30] sm:$0xff]   ;;  %v5163_v11 = vld [vmem:[%s5067_s25 + $0x80] sm:$0xff]   ;;  %v4938_v23 = vld [vmem:[%s6528_s1 + $0x8] sm:$0xff]  }
  0x17   : > { %v405_v34 = vor.u32 %v403_v20, %v5106_v27  ;;  %v419_v37 = vshrl.u32 %v5104_v24, 16  ;;  %v413_v39 = vor.u32 %v411_v22, %v409_v29  ;;  %v417_v41 = vrot.slane %v415_v31, 1  ;;  %v4937_v22 = vld [vmem:[%s6528_s1 + $0x48] sm:$0xff]  }
  0x18   : > { %v325_v25 = vor.u32 %v324_v17, %v320_v8  ;;  %v338_v40 = vsel %vm318_vm0, %v333_v26, %v337_v30  ;;  %v341_v42 = vor.u32 %v339_v32, %v337_v30  ;;  %v345_v45 = vrot.slane %v343_v35, 1 }
  0x19   : > { %4508 = vmatpush3.bf16.msra.mxu0 %v4918_v3  ;;  %4904 = vmatpush3.bf16.msra.mxu1 %v4918_v3  ;;  %v410_v44 = vsel %vm318_vm0, %v405_v34, %v409_v29  ;;  %v423_v46 = vshll.u32 %v5117_v36, 16  ;;  %v347_v47 = vshrl.u32 %v5109_v28, 16  ;;  %v418_v49 = vsel %vm318_vm0, %v413_v39, %v417_v41  ;;  %v5155_v3 = vld [vmem:[%s5067_s25 + $0x78] sm:$0xff]  }
  0x1a   : > { %v330_v33 = vsel %vm318_vm0, %v325_v25, %v329_v18  ;;  %4589 = vmatprep.subr.bf16.mxu0 %v4925_v14  ;;  %4545 = vmatprep.subr.bf16.mxu1 %v4926_v15  ;;  %v421_v50 = vor.u32 %v419_v37, %v417_v41  ;;  %v351_v51 = vshll.u32 %v5121_v38, 16  ;;  %v427_v52 = vshrl.u32 %v5117_v36, 16  ;;  %v5180_v29 = vld [vmem:[%s5067_s25 + $0x38] sm:$0xff]   ;;  %v5188_v37 = vld [vmem:[%s5067_s25 + $0x88] sm:$0xff]  }
  0x1b   : > { %4509 = vmatprep.mubr.msk.bf16.mxu0 %vm491_vm1, %v330_v33  ;;  %4529 = vmatprep.mubr.msk.bf16.mxu1 %vm491_vm1, %v410_v44  ;;  %v346_v53 = vsel %vm318_vm0, %v341_v42, %v345_v45  ;;  %v425_v54 = vrot.slane %v423_v46, 1  ;;  %v349_v55 = vor.u32 %v347_v47, %v345_v45  ;;  %v431_v56 = vshll.u32 %v5126_v43, 16  ;;  %v5193_v44 = vld [vmem:[%s5067_s25 + $0x40] sm:$0xff]  }
  0x1c   : > { %4510 = vmatmul.mubr.msk.bf16.vlgmr.msra.gmra.mxu0 %vm491_vm1, %v338_v40  ;;  %4530 = vmatmul.mubr.msk.bf16.vlgmr.msra.gmra.mxu1 %vm491_vm1, %v418_v49  ;;  %v353_v59 = vrot.slane %v351_v51, 1  ;;  %v355_v60 = vshrl.u32 %v5121_v38, 16  ;;  %v359_v0 = vshll.u32 %v5146_v58, 16  ;;  %v435_v4 = vshrl.u32 %v5126_v43, 16  ;;  %v4943_v46 = vld [vmem:[%s6528_s1] sm:$0xff]  }
  0x1d   : > { %4590 = vmatpush3.bf16.msra.mxu0 %v4925_v14  ;;  %4513 = vmatprep.mubr.msk.bf16.mxu0 %vm491_vm1, %v346_v53  ;;  %v426_v61 = vsel %vm318_vm0, %v421_v50, %v425_v54  ;;  %v429_v62 = vor.u32 %v427_v52, %v425_v54  ;;  %v433_v63 = vrot.slane %v431_v56, 1  ;;  %v363_v10 = vshrl.u32 %v5146_v58, 16  ;;  %v4942_v49 = vld [vmem:[%s5067_s25 + $0x90] ss:$0 sps:$4 sm:$0x11]   ;;  %v4944_v51 = vld [vmem:[%s6528_s1 + $0x40] sm:$0xff]  }
  0x1e   : > { %4591 = vmatprep.subr.bf16.mxu0 %v4931_v48  ;;  %4546 = vmatpush3.bf16.msra.mxu1 %v4926_v15  ;;  %v354_v1 = vsel %vm318_vm0, %v349_v55, %v353_v59  ;;  %v357_v2 = vor.u32 %v355_v60, %v353_v59  ;;  %v361_v8 = vrot.slane %v359_v0, 1  ;;  %v439_v17 = vshll.u32 %v5155_v3, 16  ;;  %v5209_v55 = vld [vmem:[%s5067_s25 + $0x48] sm:$0xff]  }
  0x1f   : > { %4547 = vmatprep.subr.bf16.mxu1 %v4932_v57  ;;  %4533 = vmatprep.mubr.msk.bf16.mxu1 %vm491_vm1, %v426_v61  ;;  %v434_v14 = vsel %vm318_vm0, %v429_v62, %v433_v63  ;;  %v437_v15 = vor.u32 %v435_v4, %v433_v63  ;;  %v443_v18 = vshrl.u32 %v5155_v3, 16  ;;  %v367_v20 = vshll.u32 %v5159_v9, 16  ;;  %v4946_v4 = vld [vmem:[%s6528_s1 + $0x78] sm:$0xff]  }
  0x20   : > { %v362_v19 = vsel %vm318_vm0, %v357_v2, %v361_v8  ;;  %v447_v21 = vshll.u32 %v5163_v11, 16  ;;  %v441_v25 = vrot.slane %v439_v17, 1  ;;  %v365_v26 = vor.u32 %v363_v10, %v361_v8  ;;  %v960_v8 = vld [vmem:[%s5067_s25] sm:$0xe]  ;;  %v4948_v10 = vld [vmem:[%s6528_s1 + $0x98] sm:$0xff]  }
  0x21   : > { %4592 = vmatpush3.bf16.msra.mxu0 %v4931_v48  ;;  %v369_v30 = vrot.slane %v367_v20, 1  ;;  %v371_v34 = vshrl.u32 %v5159_v9, 16  ;;  %v375_v35 = vshll.u32 %v5180_v29, 16  ;;  %v451_v39 = vshrl.u32 %v5163_v11, 16 }
  0x22   : > { %4548 = vmatpush3.bf16.msra.mxu1 %v4932_v57  ;;  %v449_v31 = vrot.slane %v447_v21, 1  ;;  %4593 = vmatprep.subr.bf16.mxu0 %v4937_v22  ;;  %v442_v32 = vsel %vm318_vm0, %v437_v15, %v441_v25  ;;  %v445_v33 = vor.u32 %v443_v18, %v441_v25  ;;  %v379_v45 = vshrl.u32 %v5180_v29, 16 }
  0x23   : > { %4549 = vmatprep.subr.bf16.mxu1 %v4938_v23  ;;  %v370_v40 = vsel %vm318_vm0, %v365_v26, %v369_v30  ;;  %v373_v41 = vor.u32 %v371_v34, %v369_v30  ;;  %v377_v42 = vrot.slane %v375_v35, 1  ;;  %v455_v48 = vshll.u32 %v5188_v37, 16 }
  0x24   : > { %4514 = vmatmul.mubr.msk.bf16.gmra.mxu0 %vm491_vm1, %v354_v1  ;;  %4534 = vmatmul.mubr.msk.bf16.gmra.mxu1 %vm491_vm1, %v434_v14  ;;  %v453_v47 = vor.u32 %v451_v39, %v449_v31  ;;  %v459_v50 = vshrl.u32 %v5188_v37, 16  ;;  %v450_v52 = vsel %vm318_vm0, %v445_v33, %v449_v31  ;;  %v383_v54 = vshll.u32 %v5193_v44, 16  ;;  %v4949_v31 = vld [vmem:[%s6528_s1 + $0x70] sm:$0xff]   ;;  %v4951_v33 = vld [vmem:[%s6528_s1 + $0x68] sm:$0xff]  }
  0x25   : > { %4517 = vmatprep.mubr.msk.bf16.mxu0 %vm491_vm1, %v362_v19  ;;  %4594 = vmatpush3.bf16.msra.mxu0 %v4937_v22  ;;  %v378_v53 = vsel %vm318_vm0, %v373_v41, %v377_v42  ;;  %v457_v56 = vrot.slane %v455_v48, 1  ;;  %v463_v57 = vshll.u32 %v4942_v49, 16  ;;  %v381_v59 = vor.u32 %v379_v45, %v377_v42  ;;  %v4950_v39 = vld [vmem:[%s6528_s1 + $0x90] sm:$0xff]   ;;  %v4952_v41 = vld [vmem:[%s6528_s1 + $0x88] sm:$0xff]   ;;  %v5281_v42 = vld [vmem:[%s6528_s1 + $0xb8] sm:$0xff]  }
  0x26   : > { %4537 = vmatprep.mubr.msk.bf16.mxu1 %vm491_vm1, %v442_v32  ;;  %4550 = vmatpush3.bf16.msra.mxu1 %v4938_v23  ;;  %v385_v60 = vrot.slane %v383_v54, 1  ;;  %v387_v61 = vshrl.u32 %v5193_v44, 16  ;;  %v391_v63 = vshll.u32 %v5209_v55, 16  ;;  %v395_v17 = vshrl.u32 %v5209_v55, 16  ;;  %v5298_v48 = vld [vmem:[%s6528_s1 + $0xd8] sm:$0xff]  }
  0x27   : > { %4551 = vmatprep.subr.bf16.mxu1 %v4943_v46  ;;  %4595 = vmatprep.subr.bf16.mxu0 %v4944_v51  ;;  %v458_v62 = vsel %vm318_vm0, %v453_v47, %v457_v56  ;;  %v461_v0 = vor.u32 %v459_v50, %v457_v56  ;;  %v465_v1 = vrot.slane %v463_v57, 1  ;;  %v4103_v19 = vcombine.low %v960_v8, %v5071_v5  ;;  %v2241_v54 = vld [vmem:[%s5067_s25 + $0x8] sm:$0xc]  ;;  %v5326_v56 = vld [vmem:[%s5067_s25 + $0x10] sm:$0xff]  }
  0x28   : > { %v389_v2 = vor.u32 %v387_v61, %v385_v60  ;;  %v393_v14 = vrot.slane %v391_v63, 1  ;;  %v386_v15 = vsel %vm318_vm0, %v381_v59, %v385_v60  ;;  %v974_v23 = vrot.slane %v5077_v7, 1  ;;  %v5330_v60 = vld [vmem:[%s5067_s25 + $0x18] sm:$0xff]   ;;  %v5333_v61 = vld [vmem:[%s5067_s25 + $0x20] sm:$0xff]   ;;  %v5338_v63 = vld [vmem:[%s5067_s25 + $0x28] sm:$0xff]  }
  0x29   : > { %4596 = vmatpush3.bf16.msra.mxu0 %v4944_v51  ;;  %v466_v20 = vsel %vm318_vm0, %v461_v0, %v465_v1  ;;  %v973_v22 = vrot.slane %v4103_v19, 1  ;;  %v1006_v5 = vrot.slane %v5188_v37, 1  ;;  %v1008_v30 = vrot.slane %v4942_v49, 1  ;;  %v5367_v19 = vld [vmem:[%s5067_s25 + $0x40] sm:$0xff]  }
  0x2a   : > { %4552 = vmatpush3.bf16.msra.mxu1 %v4943_v46  ;;  %4677 = vmatprep.subr.bf16.mxu0 %v4948_v10  ;;  %v394_v18 = vsel %vm318_vm0, %v389_v2, %v393_v14  ;;  %v397_v21 = vor.u32 %v395_v17, %v393_v14  ;;  %v976_v32 = vrot.slane %v5096_v16, 1  ;;  %v4954_v46 = vld [vmem:[%s6528_s1 + $0x80] sm:$0xff]   ;;  %v986_v47 = vrot.slane %v5180_v29, 1  ;;  %v5344_v2 = vld [vmem:[%s5067_s25 + $0x30] sm:$0xff]  }
  0x2b   : > { %4633 = vmatprep.subr.bf16.mxu1 %v4946_v4  ;;  %v975_v26 = vsel %vm972_vm2, %v973_v22, %v974_v23  ;;  %v2257_v0 = vrot.slane %v5330_v60, 2  ;;  %v2259_v1 = vrot.slane %v5333_v61, 2  ;;  %v996_v8 = vrot.slane %v5104_v24, 1 }
  0x2c   : > { %4518 = vmatmul.mubr.msk.bf16.gmra.mxu0 %vm491_vm1, %v370_v40  ;;  %4538 = vmatmul.mubr.msk.bf16.gmra.mxu1 %vm491_vm1, %v450_v52  ;;  %v402_v25 = vsel %vm318_vm0, %v397_v21, %v5106_v27  ;;  %v978_v27 = vrot.slane %v5109_v28, 1  ;;  %v977_v34 = vsel %vm972_vm2, %v974_v23, %v976_v32  ;;  %v982_v40 = vrot.slane %v5146_v58, 1 }
  0x2d   : > { %4521 = vmatprep.mubr.msk.bf16.mxu0 %vm491_vm1, %v378_v53  ;;  %4541 = vmatprep.mubr.msk.bf16.mxu1 %vm491_vm1, %v458_v62  ;;  %v992_v53 = vrot.slane %v5084_v12, 1  ;;  %v998_v17 = vrot.slane %v5117_v36, 1  ;;  %v2263_v21 = vrot.slane %v5344_v2, 2 }
  0x2e   : > { %v979_v35 = vsel %vm972_vm2, %v976_v32, %v978_v27  ;;  %v2267_v32 = vrot.slane %v5367_v19, 2 }
  0x34   : > { %4522 = vmatmul.mubr.msk.bf16.gmra.mxu0 %vm491_vm1, %v386_v15  ;;  %4542 = vmatmul.mubr.msk.bf16.gmra.mxu1 %vm491_vm1, %v466_v20  ;;  %v5358_v15 = vsel %vm2253_vm3, %v2257_v0, %v2259_v1  ;;  %v5370_v20 = vld [vmem:[%s5067_s25 + $0x48] sm:$0xff]  }
  0x35   : > { %4525 = vmatprep.mubr.msk.bf16.mxu0 %vm491_vm1, %v394_v18  ;;  %4553 = vmatprep.mubr.msk.bf16.mxu1 %vm491_vm1, %v5074_v6  ;;  %v5249_v6 = vsel %vm972_vm2, %v1006_v5, %v1008_v30  ;;  %v2261_v18 = vrot.slane %v5338_v63, 2 }
  0x37   : > { %v5375_v23 = vsel %vm2253_vm3, %v2259_v1, %v2261_v18 }
  0x3c   : > { %4526 = vmatmul.mubr.msk.bf16.gmra.mxu0 %vm491_vm1, %v402_v25  ;;  %4554 = vmatmul.mubr.msk.bf16.vlgmr.msra.gmra.mxu1 %vm491_vm1, %v5077_v7  ;;  %v4953_v7 = vld [vmem:[%s6528_s1 + $0x60] sm:$0xff]   ;;  %v1301_v25 = vld [vmem:[%s5067_s25 + $0x8] sm:$0xe] }
  0x3d   : > { %4597 = vmatprep.mubr.msk.bf16.mxu0 %vm491_vm1, %v975_v26  ;;  %4557 = vmatprep.mubr.msk.bf16.mxu1 %vm491_vm1, %v5096_v16  ;;  %v980_v16 = vrot.slane %v5121_v38, 1  ;;  %v5380_v26 = vsel %vm2253_vm3, %v2261_v18, %v2263_v21  ;;  %v1801_v18 = vshll.u32 %v5330_v60, 16 }
  0x3e   : > { %4634 = vmatpush3.bf16.msra.mxu1 %v4946_v4 }
  0x3f   : > { %4635 = vmatprep.subr.bf16.mxu1 %v4949_v31  ;;  %v981_v45 = vsel %vm972_vm2, %v978_v27, %v980_v16  ;;  %v2269_v27 = vrot.slane %v5370_v20, 2 }
  0x42   : > { %4636 = vmatpush3.bf16.msra.mxu1 %v4949_v31  ;;  %v5387_v31 = vld [vmem:[%s5067_s25 + $0x50] sm:$0xff]  }
  0x43   : > { %4637 = vmatprep.subr.bf16.mxu1 %v4951_v33 }
  0x44   : > { %4598 = vmatmul.mubr.msk.bf16.vlgmr.msra.gmra.mxu0 %vm491_vm1, %v977_v34  ;;  %4558 = vmatmul.mubr.msk.bf16.gmra.mxu1 %vm491_vm1, %v5109_v28  ;;  %v983_v28 = vsel %vm972_vm2, %v980_v16, %v982_v40 }
  0x45   : > { %4678 = vmatpush3.bf16.msra.mxu0 %v4948_v10  ;;  %4601 = vmatprep.mubr.msk.bf16.mxu0 %vm491_vm1, %v979_v35  ;;  %v5352_v10 = vld [vmem:[%s5067_s25 + $0x38] sm:$0xff]   ;;  %v5399_v35 = vsel %vm2253_vm3, %v2267_v32, %v2269_v27 }
  0x46   : > { %4679 = vmatprep.subr.bf16.mxu0 %v4950_v39  ;;  %4561 = vmatprep.mubr.msk.bf16.mxu1 %vm491_vm1, %v5121_v38  ;;  %v984_v38 = vrot.slane %v5159_v9, 1  ;;  %v2265_v22 = vrot.slane %v5352_v10, 2 }
  0x47   : > { %4638 = vmatpush3.bf16.msra.mxu1 %v4951_v33  ;;  %v5392_v33 = vld [vmem:[%s5067_s25 + $0x58] sm:$0xff]  }
  0x48   : > { %4639 = vmatprep.subr.bf16.mxu1 %v4953_v7  ;;  %v985_v49 = vsel %vm972_vm2, %v982_v40, %v984_v38  ;;  %v987_v50 = vsel %vm972_vm2, %v984_v38, %v986_v47  ;;  %v5383_v30 = vsel %vm2253_vm3, %v2263_v21, %v2265_v22  ;;  %v5396_v34 = vsel %vm2253_vm3, %v2265_v22, %v2267_v32 }
  0x49   : > { %4680 = vmatpush3.bf16.msra.mxu0 %v4950_v39  ;;  %v2271_v39 = vrot.slane %v5387_v31, 2  ;;  %v2273_v16 = vrot.slane %v5392_v33, 2  ;;  %v1002_v40 = vrot.slane %v5155_v3, 1  ;;  %v1442_v32 = vrot.slane %v5330_v60, 1 }
  0x4a   : > { %4681 = vmatprep.subr.bf16.mxu0 %v4952_v41 }
  0x4b   : > { %4640 = vmatpush3.bf16.msra.mxu1 %v4953_v7  ;;  %v1000_v7 = vrot.slane %v5126_v43, 1 }
  0x4c   : > { %4602 = vmatmul.mubr.msk.bf16.gmra.mxu0 %vm491_vm1, %v981_v45  ;;  %4721 = vmatprep.subr.bf16.mxu1 %v5281_v42  ;;  %v5409_v45 = vsel %vm2253_vm3, %v2269_v27, %v2271_v39  ;;  %v1444_v27 = vrot.slane %v5333_v61, 1 }
  0x4d   : > { %4605 = vmatprep.mubr.msk.bf16.mxu0 %vm491_vm1, %v983_v28  ;;  %4682 = vmatpush3.bf16.msra.mxu0 %v4952_v41  ;;  %v1004_v28 = vrot.slane %v5163_v11, 1 }
  0x4e   : > { %4562 = vmatmul.mubr.msk.bf16.gmra.mxu1 %vm491_vm1, %v5146_v58  ;;  %4683 = vmatprep.subr.bf16.mxu0 %v4954_v46  ;;  %v988_v58 = vrot.slane %v5193_v44, 1 }
  0x4f   : > { %4565 = vmatprep.mubr.msk.bf16.mxu1 %vm491_vm1, %v5159_v9  ;;  %v990_v9 = vrot.slane %v5209_v55, 1 }
  0x50   : > { %v989_v51 = vsel %vm972_vm2, %v986_v47, %v988_v58  ;;  %v5418_v47 = vld [vmem:[%s5067_s25 + $0x60] sm:$0xff]  }
  0x51   : > { %4684 = vmatpush3.bf16.msra.mxu0 %v4954_v46  ;;  %v991_v52 = vsel %vm972_vm2, %v988_v58, %v990_v9  ;;  %v993_v59 = vsel %vm972_vm2, %v990_v9, %v992_v53  ;;  %v5415_v46 = vsel %vm2253_vm3, %v2271_v39, %v2273_v16  ;;  %v1003_v58 = vsel %vm972_vm2, %v1000_v7, %v1002_v40  ;;  %v5473_v39 = vld [vmem:[%s5067_s25 + $0x80] sm:$0xff]  }
  0x52   : > { %4765 = vmatprep.subr.bf16.mxu0 %v5298_v48  ;;  %v1789_v9 = vshrl.u32 %v5326_v56, 16 }
  0x54   : > { %4606 = vmatmul.mubr.msk.bf16.gmra.mxu0 %vm491_vm1, %v985_v49  ;;  %v1001_v49 = vsel %vm972_vm2, %v998_v17, %v1000_v7  ;;  %v1791_v1 = vrot.slane %v1789_v9, 1 }
  0x55   : > { %4609 = vmatprep.mubr.msk.bf16.mxu0 %vm491_vm1, %v987_v50  ;;  %v5422_v50 = vld [vmem:[%s5067_s25 + $0x68] sm:$0xff]  }
  0x56   : > { %4566 = vmatmul.mubr.msk.bf16.gmra.mxu1 %vm491_vm1, %v5180_v29  ;;  %v994_v29 = vrot.slane %v5087_v13, 1 }
  0x57   : > { %4569 = vmatprep.mubr.msk.bf16.mxu1 %vm491_vm1, %v5193_v44  ;;  %v1302_v44 = vld [vmem:[%s5067_s25 + $0xc] sm:$0xf] }
  0x58   : > { %v4190_v57 = vcombine.low %v2241_v54, %v1302_v44  ;;  %v995_v62 = vsel %vm972_vm2, %v992_v53, %v994_v29  ;;  %v4126_v41 = vcombine.low %v1301_v25, %v1302_v44  ;;  %v1440_v44 = vrot.slane %v5326_v56, 1 }
  0x59   : > { %v1807_v25 = vshrl.u32 %v5333_v61, 16 }
  0x5a   : > { %v1781_v38 = vshrl.u32 %v4126_v41, 16 }
  0x5c   : > { %4610 = vmatmul.mubr.msk.bf16.gmra.mxu0 %vm491_vm1, %v989_v51  ;;  %v1792_v51 = vshll.u32 %v5326_v56, 16 }
  0x5d   : > { %4613 = vmatprep.mubr.msk.bf16.mxu0 %vm491_vm1, %v991_v52  ;;  %v2277_v52 = vrot.slane %v5422_v50, 2 }
  0x5e   : > { %4570 = vmatmul.mubr.msk.bf16.gmra.mxu1 %vm491_vm1, %v5209_v55  ;;  %v2255_v55 = vrot.slane %v5326_v56, 2 }
  0x5f   : > { %4573 = vmatprep.mubr.msk.bf16.mxu1 %vm491_vm1, %v5084_v12  ;;  %v2254_v12 = vrot.slane %v4190_v57, 2  ;;  %v5443_v57 = vld [vmem:[%s5067_s25 + $0x70] sm:$0xff]  }
  0x60   : > { %v5355_v14 = vsel %vm2253_vm3, %v2255_v55, %v2257_v0 }
  0x61   : > { %v5347_v4 = vsel %vm2253_vm3, %v2254_v12, %v2255_v55  ;;  %v1007_v55 = vsel %vm972_vm2, %v1004_v28, %v1006_v5  ;;  %v5450_v12 = vld [vmem:[%s5067_s25 + $0x78] sm:$0xff]   ;;  %v1798_v5 = vshrl.u32 %v5330_v60, 16  ;;  %v1445_v60 = vsel %vm972_vm2, %v1442_v32, %v1444_v27 }
  0x63   : > { %v1800_v7 = vrot.slane %v1798_v5, 1 }
  0x64   : > { %4614 = vmatmul.mubr.msk.bf16.gmra.mxu0 %vm491_vm1, %v993_v59  ;;  %v1005_v59 = vsel %vm972_vm2, %v1002_v40, %v1004_v28  ;;  %v5476_v40 = vld [vmem:[%s5067_s25 + $0x88] sm:$0xff]  }
  0x65   : > { %4617 = vmatprep.mubr.msk.bf16.mxu0 %vm491_vm1, %v995_v62  ;;  %v1783_v62 = vrot.slane %v1781_v38, 1  ;;  %v2283_v38 = vrot.slane %v5473_v39, 2 }
  0x66   : > { %4574 = vmatmul.mubr.msk.bf16.gmra.mxu1 %vm491_vm1, %v5087_v13  ;;  %v997_v13 = vsel %vm972_vm2, %v994_v29, %v996_v8  ;;  %v1439_v29 = vrot.slane %v4126_v41, 1 }
  0x67   : > { %4577 = vmatprep.mubr.msk.bf16.mxu1 %vm491_vm1, %v5104_v24  ;;  %v999_v24 = vsel %vm972_vm2, %v996_v8, %v998_v17  ;;  %v2279_v8 = vrot.slane %v5443_v57, 2 }
  0x68   : > { %v1441_v56 = vsel %vm972_vm2, %v1439_v29, %v1440_v44  ;;  %v1825_v29 = vshrl.u32 %v5344_v2, 16 }
  0x69   : > { %v5457_v17 = vsel %vm2253_vm3, %v2277_v52, %v2279_v8 }
  0x6c   : > { %4618 = vmatmul.mubr.msk.bf16.gmra.mxu0 %vm491_vm1, %v997_v13 }
  0x6d   : > { %4621 = vmatprep.mubr.msk.bf16.mxu0 %vm491_vm1, %v999_v24  ;;  %v1810_v24 = vshll.u32 %v5333_v61, 16  ;;  %v4966_v61 = vld [vmem:[%s6528_s1 + $0xb0] sm:$0xff]  }
  0x6e   : > { %4578 = vmatmul.mubr.msk.bf16.gmra.mxu1 %vm491_vm1, %v5117_v36  ;;  %v1784_v36 = vshll.u32 %v4126_v41, 16  ;;  %v1809_v41 = vrot.slane %v1807_v25, 1  ;;  %v4978_v25 = vld [vmem:[%s6528_s1 + $0xa0] sm:$0xff]  }
  0x6f   : > { %4581 = vmatprep.mubr.msk.bf16.mxu1 %vm491_vm1, %v5126_v43  ;;  %v2275_v43 = vrot.slane %v5418_v47, 2  ;;  %v1812_v28 = vrot.slane %v1810_v24, 2 }
  0x70   : > { %v1786_v0 = vrot.slane %v1784_v36, 2  ;;  %v2285_v36 = vrot.slane %v5476_v40, 2 }
  0x71   : > { %v5431_v53 = vsel %vm2253_vm3, %v2273_v16, %v2275_v43  ;;  %v5435_v54 = vsel %vm2253_vm3, %v2275_v43, %v2277_v52  ;;  %v1803_v16 = vrot.slane %v1801_v18, 2  ;;  %v1816_v43 = vshrl.u32 %v5338_v63, 16 }
  0x72   : > { %v1787_v22 = vor.u32 %v1786_v0, %v1783_v62  ;;  %v1813_v52 = vor.u32 %v1812_v28, %v1809_v41  ;;  %v4972_v62 = vld [vmem:[%s6528_s1 + $0xa8] sm:$0xff]   ;;  %v5508_v0 = vld [vmem:[%s5067_s25 + $0x90] sm:$0xff]   ;;  %v1843_v41 = vshrl.u32 %v5367_v19, 16  ;;  %v1846_v28 = vshll.u32 %v5367_v19, 16 }
  0x73   : > { %v1804_v9 = vor.u32 %v1803_v16, %v1800_v7  ;;  %v1837_v7 = vshll.u32 %v5352_v10, 16 }
  0x74   : > { %4622 = vmatmul.mubr.msk.bf16.gmra.mxu0 %vm491_vm1, %v1001_v49  ;;  %v1443_v49 = vsel %vm972_vm2, %v1440_v44, %v1442_v32  ;;  %v1828_v44 = vshll.u32 %v5344_v2, 16 }
  0x75   : > { %4625 = vmatprep.mubr.msk.bf16.mxu0 %vm491_vm1, %v1003_v58 }
  0x76   : > { %4582 = vmatmul.mubr.msk.bf16.gmra.mxu1 %vm491_vm1, %v5155_v3  ;;  %v1794_v3 = vrot.slane %v1792_v51, 2  ;;  %v1819_v51 = vshll.u32 %v5338_v63, 16  ;;  %v1830_v5 = vrot.slane %v1828_v44, 2 }
  0x77   : > { %4585 = vmatprep.mubr.msk.bf16.mxu1 %vm491_vm1, %v5163_v11  ;;  %v2281_v11 = vrot.slane %v5450_v12, 2 }
  0x78   : > { %v1795_v13 = vor.u32 %v1794_v3, %v1791_v1  ;;  %v1818_v3 = vrot.slane %v1816_v43, 1 }
  0x79   : > { %v5463_v21 = vsel %vm2253_vm3, %v2279_v8, %v2281_v11  ;;  %v5489_v58 = vsel %vm2253_vm3, %v2281_v11, %v2283_v38  ;;  %v1821_v8 = vrot.slane %v1819_v51, 2  ;;  %v5512_v11 = vld [vmem:[%s5067_s25 + $0x98] ss:$0 sps:$4 sm:$0x33]   ;;  %v1845_v51 = vrot.slane %v1843_v41, 1 }
  0x7a   : > { %v1805_v1 = vsel %vm1779_vm4, %v1795_v13, %v1804_v9 }
  0x7b   : > { %v1822_v32 = vor.u32 %v1821_v8, %v1818_v3  ;;  %v1864_v3 = vshll.u32 %v5387_v31, 16  ;;  %v5568_v8 = vld [vmem:[%s6528_s1 + $0x118] sm:$0xff]  }
  0x7c   : > { %4626 = vmatmul.mubr.msk.bf16.gmra.mxu0 %vm491_vm1, %v1005_v59  ;;  %v1446_v59 = vrot.slane %v5338_v63, 1  ;;  %v4967_v63 = vld [vmem:[%s6528_s1 + $0xd0] sm:$0xff]  }
  0x7d   : > { %4629 = vmatprep.mubr.msk.bf16.mxu0 %vm491_vm1, %v1007_v55  ;;  %v1448_v55 = vrot.slane %v5344_v2, 1  ;;  %v2287_v2 = vrot.slane %v5508_v0, 2 }
  0x7e   : > { %4586 = vmatmul.mubr.msk.bf16.gmra.mxu1 %vm491_vm1, %v5188_v37  ;;  %v1796_v37 = vsel %vm1779_vm4, %v1787_v22, %v1795_v13  ;;  %v1447_v18 = vsel %vm972_vm2, %v1444_v27, %v1446_v59  ;;  %v2289_v22 = vrot.slane %v5512_v11, 2  ;;  %v1834_v27 = vshrl.u32 %v5352_v10, 16 }
  0x7f   : > { %4641 = vmatprep.mubr.msk.bf16.mxu1 %vm491_vm1, %v1441_v56  ;;  %v1814_v56 = vsel %vm1779_vm4, %v1804_v9, %v1813_v52  ;;  %v1449_v13 = vsel %vm972_vm2, %v1446_v59, %v1448_v55  ;;  %v5527_v24 = vsel %vm2253_vm3, %v2285_v36, %v2287_v2  ;;  %v1839_v9 = vrot.slane %v1837_v7, 2 }
  0x80   : > { %v5534_v16 = vsel %vm2253_vm3, %v2287_v2, %v2289_v22  ;;  %v1852_v59 = vshrl.u32 %v5370_v20, 16  ;;  %v5578_v2 = vld [vmem:[%s5067_s25 + $0x18] sm:$0xff]  }
  0x84   : > { %4630 = vmatmul.mubr.msk.bf16.gmra.mxu0 %vm491_vm1, %v5249_v6  ;;  %v5495_v6 = vsel %vm2253_vm3, %v2283_v38, %v2285_v36  ;;  %v1450_v38 = vrot.slane %v5352_v10, 1  ;;  %v5548_v36 = vld [vmem:[%s6528_s1 + $0xf8] sm:$0xff]   ;;  %v4979_v10 = vld [vmem:[%s6528_s1 + $0xc0] sm:$0xff]  }
  0x85   : > { %4685 = vmatprep.mubr.msk.bf16.mxu0 %vm491_vm1, %v1796_v37 }
  0x86   : > { %4642 = vmatmul.mubr.msk.bf16.vlgmr.msra.gmra.mxu1 %vm491_vm1, %v1443_v49  ;;  %v1452_v49 = vrot.slane %v5367_v19, 1  ;;  %v1451_v19 = vsel %vm972_vm2, %v1448_v55, %v1450_v38 }
  0x87   : > { %4645 = vmatprep.mubr.msk.bf16.mxu1 %vm491_vm1, %v1445_v60  ;;  %4722 = vmatpush3.bf16.msra.mxu1 %v5281_v42  ;;  %v1827_v42 = vrot.slane %v1825_v29, 1  ;;  %v1823_v60 = vsel %vm1779_vm4, %v1813_v52, %v1822_v32  ;;  %v1848_v29 = vrot.slane %v1846_v28, 2 }
  0x88   : > { %4723 = vmatprep.subr.bf16.mxu1 %v4966_v61  ;;  %v1453_v52 = vsel %vm972_vm2, %v1450_v38, %v1452_v49 }
  0x89   : > { %v1831_v37 = vor.u32 %v1830_v5, %v1827_v42  ;;  %v1849_v55 = vor.u32 %v1848_v29, %v1845_v51  ;;  %v5573_v42 = vld [vmem:[%s5067_s25 + $0x14] sm:$0xf]  ;;  %v3522_v5 = vld [vmem:[%s5067_s25 + $0x10] sm:$0x8]  ;;  %v1879_v51 = vshrl.u32 %v5418_v47, 16  ;;  %v1882_v29 = vshll.u32 %v5418_v47, 16 }
  0x8b   : > { %4724 = vmatpush3.bf16.msra.mxu1 %v4966_v61  ;;  %v1836_v61 = vrot.slane %v1834_v27, 1  ;;  %v1832_v43 = vsel %vm1779_vm4, %v1822_v32, %v1831_v37  ;;  %v5583_v27 = vld [vmem:[%s5067_s25 + $0x20] sm:$0xff]  }
  0x8c   : > { %4686 = vmatmul.mubr.msk.bf16.vlgmr.msra.gmra.mxu0 %vm491_vm1, %v1805_v1  ;;  %4725 = vmatprep.subr.bf16.mxu1 %v4972_v62  ;;  %v1861_v1 = vshrl.u32 %v5387_v31, 16 }
  0x8d   : > { %4766 = vmatpush3.bf16.msra.mxu0 %v5298_v48  ;;  %4689 = vmatprep.mubr.msk.bf16.mxu0 %vm491_vm1, %v1814_v56  ;;  %v4973_v48 = vld [vmem:[%s6528_s1 + $0xc8] sm:$0xff]   ;;  %v1840_v44 = vor.u32 %v1839_v9, %v1836_v61  ;;  %v1454_v56 = vrot.slane %v5370_v20, 1  ;;  %v1870_v61 = vshrl.u32 %v5392_v33, 16  ;;  %v1873_v9 = vshll.u32 %v5392_v33, 16 }
  0x8e   : > { %4646 = vmatmul.mubr.msk.bf16.gmra.mxu1 %vm491_vm1, %v1447_v18  ;;  %4767 = vmatprep.subr.bf16.mxu0 %v4967_v63  ;;  %v4277_v18 = vcombine.low %v3522_v5, %v5573_v42  ;;  %v1863_v32 = vrot.slane %v1861_v1, 1  ;;  %v5612_v1 = vld [vmem:[%s5067_s25 + $0x30] sm:$0xff]   ;;  %v1884_v5 = vrot.slane %v1882_v29, 2 }
  0x8f   : > { %4649 = vmatprep.mubr.msk.bf16.mxu1 %vm491_vm1, %v1449_v13  ;;  %4726 = vmatpush3.bf16.msra.mxu1 %v4972_v62  ;;  %v1855_v62 = vshll.u32 %v5370_v20, 16  ;;  %v1841_v22 = vsel %vm1779_vm4, %v1831_v37, %v1840_v44  ;;  %v1854_v13 = vrot.slane %v1852_v59, 1  ;;  %v1850_v7 = vsel %vm1779_vm4, %v1840_v44, %v1849_v55 }
  0x90   : > { %4727 = vmatprep.subr.bf16.mxu1 %v4978_v25  ;;  %v1866_v20 = vrot.slane %v1864_v3, 2  ;;  %v3535_v41 = vrot.slane %v4277_v18, 3  ;;  %v1455_v28 = vsel %vm972_vm2, %v1452_v49, %v1454_v56  ;;  %v1872_v59 = vrot.slane %v1870_v61, 1 }
  0x91   : > { %4768 = vmatpush3.bf16.msra.mxu0 %v4967_v63  ;;  %v1456_v63 = vrot.slane %v5387_v31, 1  ;;  %v3536_v31 = vrot.slane %v5578_v2, 3 }
  0x92   : > { %4769 = vmatprep.subr.bf16.mxu0 %v4973_v48 }
  0x93   : > { %4728 = vmatpush3.bf16.msra.mxu1 %v4978_v25  ;;  %v1857_v25 = vrot.slane %v1855_v62, 2  ;;  %v1457_v37 = vsel %vm972_vm2, %v1454_v56, %v1456_v63  ;;  %v5593_v38 = vsel %vm3534_vm5, %v3535_v41, %v3536_v31  ;;  %v1875_v62 = vrot.slane %v1873_v9, 2  ;;  %v5640_v9 = vld [vmem:[%s5067_s25 + $0x40] sm:$0xff]  }
  0x94   : > { %4690 = vmatmul.mubr.msk.bf16.gmra.mxu0 %vm491_vm1, %v1823_v60  ;;  %4809 = vmatprep.subr.bf16.mxu1 %v5548_v36  ;;  %v1881_v56 = vrot.slane %v1879_v51, 1  ;;  %v1900_v41 = vshll.u32 %v5443_v57, 16 }
  0x95   : > { %4693 = vmatprep.mubr.msk.bf16.mxu0 %vm491_vm1, %v1832_v43  ;;  %4770 = vmatpush3.bf16.msra.mxu0 %v4973_v48  ;;  %v3538_v48 = vrot.slane %v5583_v27, 3  ;;  %v1858_v60 = vor.u32 %v1857_v25, %v1854_v13  ;;  %v1867_v43 = vor.u32 %v1866_v20, %v1863_v32  ;;  %v1876_v13 = vor.u32 %v1875_v62, %v1872_v59 }
  0x96   : > { %4650 = vmatmul.mubr.msk.bf16.gmra.mxu1 %vm491_vm1, %v1451_v19  ;;  %4771 = vmatprep.subr.bf16.mxu0 %v4979_v10  ;;  %v1460_v19 = vrot.slane %v5418_v47, 1  ;;  %v1888_v25 = vshrl.u32 %v5422_v50, 16  ;;  %v1891_v32 = vshll.u32 %v5422_v50, 16  ;;  %v1897_v20 = vshrl.u32 %v5443_v57, 16 }
  0x97   : > { %4653 = vmatprep.mubr.msk.bf16.mxu1 %vm491_vm1, %v1453_v52  ;;  %v5599_v49 = vsel %vm3534_vm5, %v3536_v31, %v3538_v48  ;;  %v5608_v52 = vld [vmem:[%s5067_s25 + $0x28] sm:$0xff]   ;;  %v1859_v44 = vsel %vm1779_vm4, %v1849_v55, %v1858_v60  ;;  %v1868_v3 = vsel %vm1779_vm4, %v1858_v60, %v1867_v43  ;;  %v1462_v31 = vrot.slane %v5422_v50, 1 }
  0x98   : > { %v3540_v18 = vrot.slane %v5608_v52, 3  ;;  %v1890_v60 = vrot.slane %v1888_v25, 1  ;;  %v1893_v61 = vrot.slane %v1891_v32, 2  ;;  %v1899_v29 = vrot.slane %v1897_v20, 1 }
  0x99   : > { %4772 = vmatpush3.bf16.msra.mxu0 %v4979_v10  ;;  %v1458_v10 = vrot.slane %v5392_v33, 1  ;;  %v3542_v33 = vrot.slane %v5612_v1, 3  ;;  %v1463_v59 = vsel %vm972_vm2, %v1460_v19, %v1462_v31  ;;  %v6531_v50 = vrot.slane %v5640_v9, 3 }
  0x9a   : > { %4853 = vmatprep.subr.bf16.mxu0 %v5568_v8  ;;  %v5621_v55 = vsel %vm3534_vm5, %v3538_v48, %v3540_v18  ;;  %v5636_v48 = vld [vmem:[%s5067_s25 + $0x38] sm:$0xff]   ;;  %v1894_v62 = vor.u32 %v1893_v61, %v1890_v60 }
  0x9b   : > { %v1461_v47 = vsel %vm972_vm2, %v1458_v10, %v1460_v19 }
  0x9c   : > { %4694 = vmatmul.mubr.msk.bf16.gmra.mxu0 %vm491_vm1, %v1841_v22  ;;  %v1459_v22 = vsel %vm972_vm2, %v1456_v63, %v1458_v10  ;;  %v5627_v63 = vsel %vm3534_vm5, %v3540_v18, %v3542_v33  ;;  %v1902_v10 = vrot.slane %v1900_v41, 2  ;;  %v1915_v18 = vshrl.u32 %v5473_v39, 16 }
  0x9d   : > { %4697 = vmatprep.mubr.msk.bf16.mxu0 %vm491_vm1, %v1850_v7  ;;  %v1885_v7 = vor.u32 %v1884_v5, %v1881_v56  ;;  %v1909_v56 = vshll.u32 %v5450_v12, 16 }
  0x9e   : > { %4654 = vmatmul.mubr.msk.bf16.gmra.mxu1 %vm491_vm1, %v1455_v28  ;;  %v1464_v28 = vrot.slane %v5443_v57, 1  ;;  %v1903_v5 = vor.u32 %v1902_v10, %v1899_v29  ;;  %v1917_v41 = vrot.slane %v1915_v18, 1  ;;  %v1936_v29 = vshll.u32 %v5508_v0, 16 }
  0x9f   : > { %4657 = vmatprep.mubr.msk.bf16.mxu1 %vm491_vm1, %v1457_v37  ;;  %v1877_v37 = vsel %vm1779_vm4, %v1867_v43, %v1876_v13  ;;  %v1886_v51 = vsel %vm1779_vm4, %v1876_v13, %v1885_v7  ;;  %v1895_v13 = vsel %vm1779_vm4, %v1885_v7, %v1894_v62  ;;  %v1911_v32 = vrot.slane %v1909_v56, 2 }
  0xa0   : > { %v1465_v57 = vsel %vm972_vm2, %v1462_v31, %v1464_v28  ;;  %v1904_v20 = vsel %vm1779_vm4, %v1894_v62, %v1903_v5  ;;  %v1472_v10 = vrot.slane %v5508_v0, 1  ;;  %v1938_v56 = vrot.slane %v1936_v29, 2 }
  0xa1   : > { %v2725_v29 = vrot.slane %v5608_v52, 2 }
  0xa4   : > { %4698 = vmatmul.mubr.msk.bf16.gmra.mxu0 %vm491_vm1, %v1859_v44  ;;  %v3544_v44 = vrot.slane %v5636_v48, 3 }
  0xa5   : > { %4701 = vmatprep.mubr.msk.bf16.mxu0 %vm491_vm1, %v1868_v3  ;;  %v1906_v3 = vshrl.u32 %v5450_v12, 16 }
  0xa6   : > { %4658 = vmatmul.mubr.msk.bf16.gmra.mxu1 %vm491_vm1, %v1459_v22  ;;  %v5649_v43 = vsel %vm3534_vm5, %v3542_v33, %v3544_v44  ;;  %v5657_v19 = vsel %vm3534_vm5, %v3544_v44, %v6531_v50  ;;  %v1918_v22 = vshll.u32 %v5473_v39, 16  ;;  %v1466_v33 = vrot.slane %v5450_v12, 1  ;;  %v5873_v50 = vld [vmem:[%s5067_s25 + $0x88] sm:$0xff]  }
  0xa7   : > { %4661 = vmatprep.mubr.msk.bf16.mxu1 %vm491_vm1, %v1461_v47  ;;  %v1468_v47 = vrot.slane %v5473_v39, 1  ;;  %v1908_v25 = vrot.slane %v1906_v3, 1  ;;  %v1924_v12 = vshrl.u32 %v5476_v40, 16  ;;  %v1927_v39 = vshll.u32 %v5476_v40, 16  ;;  %6552 = vst [vmem:[#allocation16_spill] sm:$0xff] %v5873_v50 }
  0xa8   : > { %v1920_v31 = vrot.slane %v1918_v22, 2  ;;  %v4981_v22 = vld [vmem:[%s5067_s25 + $0x98] ss:$0 sps:$4 sm:$0x11]  }
  0xa9   : > { %v1469_v60 = vsel %vm972_vm2, %v1466_v33, %v1468_v47  ;;  %v1912_v61 = vor.u32 %v1911_v32, %v1908_v25  ;;  %v1474_v25 = vrot.slane %v4981_v22, 1  ;;  %v2582_v32 = vld [vmem:[%s5067_s25 + $0x10] sm:$0xc] }
  0xaa   : > { %v1921_v7 = vor.u32 %v1920_v31, %v1917_v41 }
  0xab   : > { %v1913_v44 = vsel %vm1779_vm4, %v1903_v5, %v1912_v61  ;;  %v1945_v5 = vshll.u32 %v5512_v11, 16 }
  0xac   : > { %4702 = vmatmul.mubr.msk.bf16.gmra.mxu0 %vm491_vm1, %v1877_v37  ;;  %v1467_v37 = vsel %vm972_vm2, %v1464_v28, %v1466_v33  ;;  %v1470_v28 = vrot.slane %v5476_v40, 1  ;;  %v1922_v62 = vsel %vm1779_vm4, %v1912_v61, %v1921_v7 }
  0xad   : > { %4705 = vmatprep.mubr.msk.bf16.mxu0 %vm491_vm1, %v1886_v51  ;;  %v1933_v51 = vshrl.u32 %v5508_v0, 16  ;;  %v1942_v0 = vshrl.u32 %v5512_v11, 16  ;;  %v1947_v41 = vrot.slane %v1945_v5, 2  ;;  %v5769_v5 = vld [vmem:[%s5067_s25 + $0x50] sm:$0xff]  }
  0xae   : > { %4662 = vmatmul.mubr.msk.bf16.gmra.mxu1 %vm491_vm1, %v1463_v59  ;;  %v1926_v59 = vrot.slane %v1924_v12, 1  ;;  %v1471_v18 = vsel %vm972_vm2, %v1468_v47, %v1470_v28  ;;  %v1473_v33 = vsel %vm972_vm2, %v1470_v28, %v1472_v10  ;;  %v2721_v12 = vrot.slane %v5578_v2, 2 }
  0xaf   : > { %4665 = vmatprep.mubr.msk.bf16.mxu1 %vm491_vm1, %v1465_v57  ;;  %v1929_v57 = vrot.slane %v1927_v39, 2  ;;  %v1935_v3 = vrot.slane %v1933_v51, 1  ;;  %v2723_v51 = vrot.slane %v5583_v27, 2 }
  0xb1   : > { %v1930_v40 = vor.u32 %v1929_v57, %v1926_v59  ;;  %v2724_v28 = vsel %vm2253_vm3, %v2721_v12, %v2723_v51  ;;  %v5000_v59 = vld [vmem:[%s6528_s1 + $0x108] sm:$0xff]  }
  0xb3   : > { %v1931_v47 = vsel %vm1779_vm4, %v1921_v7, %v1930_v40  ;;  %v4993_v7 = vld [vmem:[%s6528_s1 + $0xf0] sm:$0xff]  }
  0xb4   : > { %4706 = vmatmul.mubr.msk.bf16.gmra.mxu0 %vm491_vm1, %v1895_v13  ;;  %v1939_v13 = vor.u32 %v1938_v56, %v1935_v3 }
  0xb5   : > { %4709 = vmatprep.mubr.msk.bf16.mxu0 %vm491_vm1, %v1904_v20  ;;  %v1944_v20 = vrot.slane %v1942_v0, 1 }
  0xb6   : > { %4666 = vmatmul.mubr.msk.bf16.gmra.mxu1 %vm491_vm1, %v1467_v37  ;;  %v1940_v31 = vsel %vm1779_vm4, %v1930_v40, %v1939_v13  ;;  %v5694_v37 = vcombine.low %v2582_v32, %v5573_v42  ;;  %v5777_v32 = vld [vmem:[%s5067_s25 + $0x58] sm:$0xff]  }
  0xb7   : > { %4669 = vmatprep.mubr.msk.bf16.mxu1 %vm491_vm1, %v1469_v60  ;;  %v1475_v60 = vsel %vm972_vm2, %v1472_v10, %v1474_v25  ;;  %v1948_v11 = vor.u32 %v1947_v41, %v1944_v20  ;;  %v2726_v10 = vsel %vm2253_vm3, %v2723_v51, %v2725_v29  ;;  %v2735_v20 = vrot.slane %v5769_v5, 2  ;;  %v5809_v51 = vld [vmem:[%s5067_s25 + $0x68] sm:$0xff]  }
  0xb8   : > { %v2720_v61 = vrot.slane %v5694_v37, 2 }
  0xb9   : > { %v1949_v39 = vsel %vm1779_vm4, %v1939_v13, %v1948_v11 }
  0xba   : > { %v2722_v42 = vsel %vm2253_vm3, %v2720_v61, %v2721_v12 }
  0xbc   : > { %4710 = vmatmul.mubr.msk.bf16.gmra.mxu0 %vm491_vm1, %v1913_v44  ;;  %v2729_v44 = vrot.slane %v5636_v48, 2 }
  0xbd   : > { %4713 = vmatprep.mubr.msk.bf16.mxu0 %vm491_vm1, %v1922_v62  ;;  %v5744_v62 = vld [vmem:[%s5067_s25 + $0x48] sm:$0xff]  }
  0xbe   : > { %4670 = vmatmul.mubr.msk.bf16.gmra.mxu1 %vm491_vm1, %v1471_v18  ;;  %v2733_v22 = vrot.slane %v5744_v62, 2 }
  0xbf   : > { %4673 = vmatprep.mubr.msk.bf16.mxu1 %vm491_vm1, %v1473_v33 }
  0xc0   : > { %v2736_v12 = vsel %vm2253_vm3, %v2733_v22, %v2735_v20 }
  0xc4   : > { %4714 = vmatmul.mubr.msk.bf16.gmra.mxu0 %vm491_vm1, %v1931_v47 }
  0xc5   : > { %4717 = vmatprep.mubr.msk.bf16.mxu0 %vm491_vm1, %v1940_v31 }
  0xc6   : > { %4674 = vmatmul.mubr.msk.bf16.gmra.mxu1 %vm491_vm1, %v1475_v60  ;;  %v2737_v60 = vrot.slane %v5777_v32, 2 }
  0xc7   : > { %4729 = vmatprep.mubr.msk.bf16.mxu1 %vm491_vm1, %v5347_v4  ;;  %v4999_v4 = vld [vmem:[%s6528_s1 + $0xe8] sm:$0xff]  }
  0xcc   : > { %4718 = vmatmul.mubr.msk.bf16.gmra.mxu0 %vm491_vm1, %v1949_v39  ;;  %v5801_v39 = vld [vmem:[%s5067_s25 + $0x60] sm:$0xff]  }
  0xcd   : > { %4773 = vmatprep.mubr.msk.bf16.mxu0 %vm491_vm1, %v2722_v42 }
  0xce   : > { %4730 = vmatmul.mubr.msk.bf16.vlgmr.msra.gmra.mxu1 %vm491_vm1, %v5355_v14  ;;  %v4994_v14 = vld [vmem:[%s6528_s1 + $0x110] sm:$0xff]  }
  0xcf   : > { %4733 = vmatprep.mubr.msk.bf16.mxu1 %vm491_vm1, %v5358_v15  ;;  %4810 = vmatpush3.bf16.msra.mxu1 %v5548_v36  ;;  %v5005_v15 = vld [vmem:[%s6528_s1 + $0xe0] sm:$0xff]   ;;  %v2727_v36 = vrot.slane %v5612_v1, 2 }
  0xd0   : > { %4811 = vmatprep.subr.bf16.mxu1 %v4993_v7 }
  0xd1   : > { %v2730_v57 = vsel %vm2253_vm3, %v2727_v36, %v2729_v44 }
  0xd3   : > { %4812 = vmatpush3.bf16.msra.mxu1 %v4993_v7 }
  0xd4   : > { %4774 = vmatmul.mubr.msk.bf16.vlgmr.msra.gmra.mxu0 %vm491_vm1, %v2724_v28  ;;  %4813 = vmatprep.subr.bf16.mxu1 %v4999_v4 }
  0xd5   : > { %4854 = vmatpush3.bf16.msra.mxu0 %v5568_v8  ;;  %4777 = vmatprep.mubr.msk.bf16.mxu0 %vm491_vm1, %v2726_v10  ;;  %v2728_v8 = vsel %vm2253_vm3, %v2725_v29, %v2727_v36 }
  0xd6   : > { %4734 = vmatmul.mubr.msk.bf16.gmra.mxu1 %vm491_vm1, %v5375_v23  ;;  %4855 = vmatprep.subr.bf16.mxu0 %v4994_v14  ;;  %v5006_v23 = vld [vmem:[%s6528_s1 + $0x100] sm:$0xff]  }
  0xd7   : > { %4737 = vmatprep.mubr.msk.bf16.mxu1 %vm491_vm1, %v5380_v26  ;;  %4814 = vmatpush3.bf16.msra.mxu1 %v4999_v4  ;;  %v2731_v26 = vrot.slane %v5640_v9, 2  ;;  %v2739_v4 = vrot.slane %v5801_v39, 2 }
  0xd8   : > { %4815 = vmatprep.subr.bf16.mxu1 %v5005_v15 }
  0xd9   : > { %4856 = vmatpush3.bf16.msra.mxu0 %v4994_v14  ;;  %v2732_v0 = vsel %vm2253_vm3, %v2729_v44, %v2731_v26  ;;  %v2734_v25 = vsel %vm2253_vm3, %v2731_v26, %v2733_v22  ;;  %v2741_v14 = vrot.slane %v5809_v51, 2  ;;  %v2740_v44 = vsel %vm2253_vm3, %v2737_v60, %v2739_v4 }
  0xda   : > { %4857 = vmatprep.subr.bf16.mxu0 %v5000_v59 }
  0xdb   : > { %4816 = vmatpush3.bf16.msra.mxu1 %v5005_v15 }
  0xdc   : > { %v5749_v3 = vpop.f32.mrf.mxu0  ;;  %4778 = vmatmul.mubr.msk.bf16.gmra.mxu0 %vm491_vm1, %v2728_v8  ;;  %v5754_v56 = vpop.f32.mrf.mxu1 }
  0xdd   : > { %4781 = vmatprep.mubr.msk.bf16.mxu0 %vm491_vm1, %v2730_v57  ;;  %4858 = vmatpush3.bf16.msra.mxu0 %v5000_v59  ;;  %v5833_v59 = vld [vmem:[%s5067_s25 + $0x70] sm:$0xff]  }
  0xde   : > { %4738 = vmatmul.mubr.msk.bf16.gmra.mxu1 %vm491_vm1, %v5383_v30  ;;  %v5758_v18 = vpop.f32.mrf.mxu0  ;;  %4859 = vmatprep.subr.bf16.mxu0 %v5006_v23  ;;  %v5763_v33 = vpop.f32.mrf.mxu1  ;;  %v2743_v22 = vrot.slane %v5833_v59, 2 }
  0xdf   : > { %4741 = vmatprep.mubr.msk.bf16.mxu1 %vm491_vm1, %v5396_v34 }
  0xe0   : > { %v5765_v40 = vpop.f32.mrf.mxu0  ;;  %v5771_v13 = vpop.f32.mrf.mxu1 }
  0xe1   : > { %4860 = vmatpush3.bf16.msra.mxu0 %v5006_v23  ;;  %v5841_v23 = vld [vmem:[%s5067_s25 + $0x78] sm:$0xff]  }
  0xe2   : > { %v5773_v30 = vpop.f32.mrf.mxu0  ;;  %v5779_v47 = vpop.f32.mrf.mxu1  ;;  %6546 = vst [vmem:[#allocation10_spill] sm:$0xff] %v5841_v23 }
  0xe3   : > { %6538 = vst [vmem:[#allocation2_spill] sm:$0xff] %v5779_v47 }
  0xe4   : > { %v5781_v34 = vpop.f32.mrf.mxu0  ;;  %4782 = vmatmul.mubr.msk.bf16.gmra.mxu0 %vm491_vm1, %v2732_v0  ;;  %v5786_v41 = vpop.f32.mrf.mxu1 }
  0xe5   : > { %4785 = vmatprep.mubr.msk.bf16.mxu0 %vm491_vm1, %v2734_v25  ;;  %6539 = vst [vmem:[#allocation3_spill] sm:$0xff] %v5786_v41 }
  0xe6   : > { %4742 = vmatmul.mubr.msk.bf16.gmra.mxu1 %vm491_vm1, %v5399_v35  ;;  %v5790_v31 = vpop.f32.mrf.mxu0  ;;  %v5795_v11 = vpop.f32.mrf.mxu1  ;;  %v2738_v35 = vsel %vm2253_vm3, %v2735_v20, %v2737_v60  ;;  %v2745_v20 = vrot.slane %v5841_v23, 2 }
  0xe7   : > { %4745 = vmatprep.mubr.msk.bf16.mxu1 %vm491_vm1, %v5409_v45  ;;  %6540 = vst [vmem:[#allocation4_spill] sm:$0xff] %v5795_v11 }
  0xe8   : > { %v5797_v61 = vpop.f32.mrf.mxu0  ;;  %v5803_v42 = vpop.f32.mrf.mxu1 }
  0xe9   : > { %6541 = vst [vmem:[#allocation5_spill] sm:$0xff] %v5803_v42 }
  0xea   : > { %v5805_v7 = vpop.f32.mrf.mxu0  ;;  %v5811_v29 = vpop.f32.mrf.mxu1 }
  0xeb   : > { %6542 = vst [vmem:[#allocation6_spill] sm:$0xff] %v5811_v29 }
  0xec   : > { %v5813_v45 = vpop.f32.mrf.mxu0  ;;  %4786 = vmatmul.mubr.msk.bf16.gmra.mxu0 %vm491_vm1, %v2736_v12  ;;  %v5818_v28 = vpop.f32.mrf.mxu1 }
  0xed   : > { %4789 = vmatprep.mubr.msk.bf16.mxu0 %vm491_vm1, %v2738_v35  ;;  %6543 = vst [vmem:[#allocation7_spill] sm:$0xff] %v5818_v28  ;;  %v2744_v35 = vsel %vm2253_vm3, %v2741_v14, %v2743_v22 }
  0xee   : > { %4746 = vmatmul.mubr.msk.bf16.gmra.mxu1 %vm491_vm1, %v5415_v46  ;;  %v5822_v10 = vpop.f32.mrf.mxu0  ;;  %v5827_v15 = vpop.f32.mrf.mxu1  ;;  %v2742_v46 = vsel %vm2253_vm3, %v2739_v4, %v2741_v14  ;;  %v5865_v4 = vld [vmem:[%s5067_s25 + $0x80] sm:$0xff]  }
  0xef   : > { %4749 = vmatprep.mubr.msk.bf16.mxu1 %vm491_vm1, %v5431_v53  ;;  %6544 = vst [vmem:[#allocation8_spill] sm:$0xff] %v5827_v15  ;;  %6550 = vst [vmem:[#allocation14_spill] sm:$0xff] %v5865_v4  ;;  %v3070_v15 = vshrl.u32 %v5578_v2, 16 }
  0xf0   : > { %v5829_v36 = vpop.f32.mrf.mxu0  ;;  %v5835_v8 = vpop.f32.mrf.mxu1 }
  0xf1   : > { %6545 = vst [vmem:[#allocation9_spill] sm:$0xff] %v5835_v8  ;;  %v3065_v8 = vshll.u32 %v5694_v37, 16 }
  0xf2   : > { %v5837_v57 = vpop.f32.mrf.mxu0  ;;  %v5843_v26 = vpop.f32.mrf.mxu1 }
  0xf3   : > { %6547 = vst [vmem:[#allocation11_spill] sm:$0xff] %v5843_v26  ;;  %v3067_v41 = vrot.slane %v3065_v8, 3 }
  0xf4   : > { %v5845_v53 = vpop.f32.mrf.mxu0  ;;  %4790 = vmatmul.mubr.msk.bf16.gmra.mxu0 %vm491_vm1, %v2740_v44  ;;  %v5850_v0 = vpop.f32.mrf.mxu1 }
  0xf5   : > { %4793 = vmatprep.mubr.msk.bf16.mxu0 %vm491_vm1, %v2742_v46  ;;  %6548 = vst [vmem:[#allocation12_spill] sm:$0xff] %v5850_v0 }
  0xf6   : > { %4750 = vmatmul.mubr.msk.bf16.gmra.mxu1 %vm491_vm1, %v5435_v54  ;;  %v5854_v25 = vpop.f32.mrf.mxu0  ;;  %v5859_v60 = vpop.f32.mrf.mxu1  ;;  %v2746_v54 = vsel %vm2253_vm3, %v2743_v22, %v2745_v20  ;;  %v2749_v22 = vrot.slane %v5873_v50, 2  ;;  %v5899_v50 = vld [vmem:[%s5067_s25 + $0x90] sm:$0xff]  }
  0xf7   : > { %4753 = vmatprep.mubr.msk.bf16.mxu1 %vm491_vm1, %v5457_v17  ;;  %6549 = vst [vmem:[#allocation13_spill] sm:$0xff] %v5859_v60  ;;  %v2747_v17 = vrot.slane %v5865_v4, 2  ;;  %v5905_v4 = vld [vmem:[%s5067_s25 + $0x98] sm:$0xff]  }
  0xf8   : > { %v5861_v12 = vpop.f32.mrf.mxu0  ;;  %v5867_v44 = vpop.f32.mrf.mxu1 }
  0xf9   : > { %6551 = vst [vmem:[#allocation15_spill] sm:$0xff] %v5867_v44  ;;  %v2748_v29 = vsel %vm2253_vm3, %v2745_v20, %v2747_v17 }
  0xfa   : > { %v5869_v46 = vpop.f32.mrf.mxu0  ;;  %v5875_v0 = vpop.f32.mrf.mxu1 }
  0xfb   : > { %6553 = vst [vmem:[#allocation17_spill] sm:$0xff] %v5875_v0 }
  0xfc   : > { %v5877_v26 = vpop.f32.mrf.mxu0  ;;  %4794 = vmatmul.mubr.msk.bf16.gmra.mxu0 %vm491_vm1, %v2744_v35  ;;  %v4555_v14 = vpop.f32.mrf.mxu1 }
  0xfd   : > { %4797 = vmatprep.mubr.msk.bf16.mxu0 %vm491_vm1, %v2746_v54  ;;  %v826_v0 = vadd.f32 %v4555_v14, %v5749_v3  ;;  %v3062_v54 = vshrl.u32 %v5694_v37, 16 }
  0xfe   : > { %4754 = vmatmul.mubr.msk.bf16.gmra.mxu1 %vm491_vm1, %v5463_v21  ;;  %v5884_v44 = vpop.f32.mrf.mxu0  ;;  %v817_v35 = vpop.f32.mrf.mxu1  ;;  %v3073_v21 = vshll.u32 %v5578_v2, 16 }
  0xff   : > { %4757 = vmatprep.mubr.msk.bf16.mxu1 %vm491_vm1, %v5489_v58  ;;  %v818_v28 = vadd.f32 %v817_v35, %v5758_v18  ;;  %v2750_v58 = vsel %vm2253_vm3, %v2747_v17, %v2749_v22  ;;  %v3064_v2 = vrot.slane %v3062_v54, 2  ;;  %v3072_v18 = vrot.slane %v3070_v15, 2 }
 0x100   : > { %v5890_v60 = vpop.f32.mrf.mxu0  ;;  %v4556_v3 = vpop.f32.mrf.mxu1  ;;  %v3075_v35 = vrot.slane %v3073_v21, 3  ;;  %v2751_v17 = vrot.slane %v5899_v50, 2 }
 0x101   : > { %v829_v42 = vadd.f32 %v4556_v3, %v5765_v40  ;;  %v2753_v3 = vrot.slane %v5905_v4, 2  ;;  %v3068_v54 = vor.u32 %v3067_v41, %v3064_v2 }
 0x102   : > { %v5901_v14 = vpop.f32.mrf.mxu0  ;;  %v820_v37 = vpop.f32.mrf.mxu1  ;;  %v3076_v21 = vor.u32 %v3075_v35, %v3072_v18 }
 0x103   : > { %v821_v20 = vadd.f32 %v820_v37, %v5773_v30  ;;  %v3079_v30 = vshrl.u32 %v5583_v27, 16 }
 0x104   : > { %v4599_v11 = vpop.f32.mrf.mxu0  ;;  %4798 = vmatmul.mubr.msk.bf16.gmra.mxu0 %vm491_vm1, %v2748_v29  ;;  %v4559_v23 = vpop.f32.mrf.mxu1 }
 0x105   : > { %v5910_v47 = vadd.f32 %v4599_v11, %v826_v0  ;;  %4801 = vmatprep.mubr.msk.bf16.mxu0 %vm491_vm1, %v2750_v58  ;;  %v842_v29 = vadd.f32 %v4559_v23, %v5781_v34  ;;  %v3082_v11 = vshll.u32 %v5583_v27, 16  ;;  %v3091_v58 = vshll.u32 %v5608_v52, 16 }
 0x106   : > { %4758 = vmatmul.mubr.msk.bf16.gmra.mxu1 %vm491_vm1, %v5495_v6  ;;  %v1122_v40 = vpop.f32.mrf.mxu0  ;;  %v833_v8 = vpop.f32.mrf.mxu1  ;;  %v3088_v6 = vshrl.u32 %v5608_v52, 16  ;;  %v2754_v27 = vsel %vm2253_vm3, %v2751_v17, %v2753_v3  ;;  %v3081_v2 = vrot.slane %v3079_v30, 2  ;;  %v3097_v30 = vshrl.u32 %v5612_v1, 16 }
 0x107   : > { %v5918_v15 = vadd.f32 %v1122_v40, %v818_v28  ;;  %4761 = vmatprep.mubr.msk.bf16.mxu1 %vm491_vm1, %v5527_v24  ;;  %v834_v37 = vadd.f32 %v833_v8, %v5790_v31  ;;  %v2752_v28 = vsel %vm2253_vm3, %v2749_v22, %v2751_v17  ;;  %v5010_v24 = vld [vmem:[%s5067_s25 + $0xa0] ss:$0 sps:$4 sm:$0x33]   ;;  %v3084_v18 = vrot.slane %v3082_v11, 3 }
 0x108   : > { %v4600_v0 = vpop.f32.mrf.mxu0  ;;  %v4560_v23 = vpop.f32.mrf.mxu1  ;;  %v3077_v31 = vsel %vm3060_vm6, %v3068_v54, %v3076_v21  ;;  %v3093_v22 = vrot.slane %v3091_v58, 3  ;;  %v2755_v17 = vrot.slane %v5010_v24, 2  ;;  %v3100_v11 = vshll.u32 %v5612_v1, 16 }
 0x109   : > { %6554 = vst [vmem:[#allocation18_spill] sm:$0xff] %v5918_v15  ;;  %v5927_v34 = vadd.f32 %v4600_v0, %v829_v42  ;;  %v845_v15 = vadd.f32 %v4560_v23, %v5797_v61  ;;  %v3090_v42 = vrot.slane %v3088_v6, 2  ;;  %v3106_v24 = vshrl.u32 %v5636_v48, 16 }
 0x10a   : > { %v1125_v40 = vpop.f32.mrf.mxu0  ;;  %v836_v35 = vpop.f32.mrf.mxu1  ;;  %v3109_v23 = vshll.u32 %v5636_v48, 16  ;;  %v2756_v1 = vsel %vm2253_vm3, %v2753_v3, %v2755_v17 }
 0x10b   : > { %v5933_v41 = vadd.f32 %v1125_v40, %v821_v20  ;;  %v837_v8 = vadd.f32 %v836_v35, %v5805_v7  ;;  %v3085_v7 = vor.u32 %v3084_v18, %v3081_v2  ;;  %v3102_v35 = vrot.slane %v3100_v11, 3 }
 0x10c   : > { %v4603_v52 = vpop.f32.mrf.mxu0  ;;  %4802 = vmatmul.mubr.msk.bf16.gmra.mxu0 %vm491_vm1, %v2752_v28  ;;  %v3094_v28 = vor.u32 %v3093_v22, %v3090_v42 }
 0x10d   : > { %v5938_v0 = vadd.f32 %v4603_v52, %v842_v29  ;;  %4805 = vmatprep.mubr.msk.bf16.mxu0 %vm491_vm1, %v2754_v27  ;;  %v3086_v18 = vsel %vm3060_vm6, %v3076_v21, %v3085_v7 }
 0x10e   : > { %v4563_v61 = vpop.f32.mrf.mxu1  ;;  %4762 = vmatmul.mubr.msk.bf16.gmra.mxu1 %vm491_vm1, %v5534_v16  ;;  %v1138_v20 = vpop.f32.mrf.mxu0  ;;  %v3095_v48 = vsel %vm3060_vm6, %v3085_v7, %v3094_v28  ;;  %v3127_v7 = vshll.u32 %v5744_v62, 16 }
 0x10f   : > { %v858_v54 = vadd.f32 %v4563_v61, %v5813_v45  ;;  %v5946_v6 = vadd.f32 %v1138_v20, %v834_v37  ;;  %4817 = vmatprep.mubr.msk.bf16.mxu1 %vm491_vm1, %v3077_v31  ;;  %v3099_v37 = vrot.slane %v3097_v30, 2  ;;  %v3115_v20 = vshrl.u32 %v5640_v9, 16 }
 0x110   : > { %v849_v29 = vpop.f32.mrf.mxu1  ;;  %v4604_v58 = vpop.f32.mrf.mxu0 }
 0x111   : > { %v850_v16 = vadd.f32 %v849_v29, %v5822_v10  ;;  %v5952_v40 = vadd.f32 %v4604_v58, %v845_v15  ;;  %v3108_v10 = vrot.slane %v3106_v24, 2  ;;  %v3111_v15 = vrot.slane %v3109_v23, 3 }
 0x112   : > { %v4564_v27 = vpop.f32.mrf.mxu1  ;;  %v1141_v45 = vpop.f32.mrf.mxu0  ;;  %v3103_v21 = vor.u32 %v3102_v35, %v3099_v37 }
 0x113   : > { %v861_v52 = vadd.f32 %v4564_v27, %v5829_v36  ;;  %v5956_v2 = vadd.f32 %v1141_v45, %v837_v8  ;;  %v3117_v27 = vrot.slane %v3115_v20, 2 }
 0x114   : > { %v852_v31 = vpop.f32.mrf.mxu1  ;;  %v4607_v42 = vpop.f32.mrf.mxu0  ;;  %4806 = vmatmul.mubr.msk.bf16.gmra.mxu0 %vm491_vm1, %v2756_v1  ;;  %v3104_v23 = vsel %vm3060_vm6, %v3094_v28, %v3103_v21 }
 0x115   : > { %v853_v3 = vadd.f32 %v852_v31, %v5837_v57  ;;  %v5962_v22 = vadd.f32 %v4607_v42, %v858_v54  ;;  %4861 = vmatprep.mubr.msk.bf16.mxu0 %vm491_vm1, %v5593_v38  ;;  %v3118_v57 = vshll.u32 %v5640_v9, 16  ;;  %v3112_v54 = vor.u32 %v3111_v15, %v3108_v10 }
 0x116   : > { %v4567_v36 = vpop.f32.mrf.mxu1  ;;  %4818 = vmatmul.mubr.msk.bf16.vlgmr.msra.gmra.mxu1 %vm491_vm1, %v3086_v18  ;;  %v1154_v8 = vpop.f32.mrf.mxu0  ;;  %v3124_v38 = vshrl.u32 %v5744_v62, 16  ;;  %v3136_v10 = vshll.u32 %v5769_v5, 16 }
 0x117   : > { %v874_v17 = vadd.f32 %v4567_v36, %v5845_v53  ;;  %v5968_v61 = vadd.f32 %v1154_v8, %v850_v16  ;;  %4821 = vmatprep.mubr.msk.bf16.mxu1 %vm491_vm1, %v3095_v48  ;;  %v3120_v45 = vrot.slane %v3118_v57, 3  ;;  %v3113_v18 = vsel %vm3060_vm6, %v3103_v21, %v3112_v54 }
 0x118   : > { %v865_v30 = vpop.f32.mrf.mxu1  ;;  %v4608_v11 = vpop.f32.mrf.mxu0  ;;  %v3133_v48 = vshrl.u32 %v5769_v5, 16  ;;  %v3145_v21 = vshll.u32 %v5777_v32, 16 }
 0x119   : > { %v866_v29 = vadd.f32 %v865_v30, %v5854_v25  ;;  %v5976_v58 = vadd.f32 %v4608_v11, %v861_v52  ;;  %v3126_v25 = vrot.slane %v3124_v38, 2  ;;  %v3129_v52 = vrot.slane %v3127_v7, 3 }
 0x11a   : > { %v4568_v53 = vpop.f32.mrf.mxu1  ;;  %v1157_v24 = vpop.f32.mrf.mxu0  ;;  %v3135_v11 = vrot.slane %v3133_v48, 2 }
 0x11b   : > { %v877_v16 = vadd.f32 %v4568_v53, %v5861_v12  ;;  %v5980_v1 = vadd.f32 %v1157_v24, %v853_v3  ;;  %v3130_v8 = vor.u32 %v3129_v52, %v3126_v25 }
 0x11c   : > { %v868_v37 = vpop.f32.mrf.mxu1  ;;  %v4611_v35 = vpop.f32.mrf.mxu0  ;;  %4862 = vmatmul.mubr.msk.bf16.vlgmr.msra.gmra.mxu0 %vm491_vm1, %v5599_v49 }
 0x11d   : > { %v869_v31 = vadd.f32 %v868_v37, %v5869_v46  ;;  %v5986_v42 = vadd.f32 %v4611_v35, %v874_v17  ;;  %4865 = vmatprep.mubr.msk.bf16.mxu0 %vm491_vm1, %v5621_v55  ;;  %v3121_v46 = vor.u32 %v3120_v45, %v3117_v27  ;;  %v3142_v55 = vshrl.u32 %v5777_v32, 16 }
 0x11e   : > { %v4571_v12 = vpop.f32.mrf.mxu1  ;;  %4822 = vmatmul.mubr.msk.bf16.gmra.mxu1 %vm491_vm1, %v3104_v23  ;;  %v1170_v28 = vpop.f32.mrf.mxu0  ;;  %v3548_v35 = vrot.slane %v5744_v62, 3 }
 0x11f   : > { %v890_v49 = vadd.f32 %v4571_v12, %v5877_v26  ;;  %v5994_v15 = vadd.f32 %v1170_v28, %v866_v29  ;;  %4825 = vmatprep.mubr.msk.bf16.mxu1 %vm491_vm1, %v3113_v18  ;;  %v3138_v26 = vrot.slane %v3136_v10, 3  ;;  %v3122_v29 = vsel %vm3060_vm6, %v3112_v54, %v3121_v46 }
 0x120   : > { %v881_v3 = vpop.f32.mrf.mxu1  ;;  %v4612_v36 = vpop.f32.mrf.mxu0  ;;  %v3131_v23 = vsel %vm3060_vm6, %v3121_v46, %v3130_v8  ;;  %v3163_v12 = vshll.u32 %v5809_v51, 16 }
 0x121   : > { %v882_v17 = vadd.f32 %v881_v3, %v5884_v44  ;;  %v6000_v20 = vadd.f32 %v4612_v36, %v877_v16  ;;  %v3144_v44 = vrot.slane %v3142_v55, 2  ;;  %v3147_v16 = vrot.slane %v3145_v21, 3 }
 0x122   : > { %v4572_v57 = vpop.f32.mrf.mxu1  ;;  %v1173_v30 = vpop.f32.mrf.mxu0  ;;  %v3139_v37 = vor.u32 %v3138_v26, %v3135_v11  ;;  %v3165_v26 = vrot.slane %v3163_v12, 3 }
 0x123   : > { %v893_v38 = vadd.f32 %v4572_v57, %v5890_v60  ;;  %v6003_v7 = vadd.f32 %v1173_v30, %v869_v31  ;;  %v3148_v31 = vor.u32 %v3147_v16, %v3144_v44 }
 0x124   : > { %v884_v53 = vpop.f32.mrf.mxu1  ;;  %v4615_v24 = vpop.f32.mrf.mxu0  ;;  %4866 = vmatmul.mubr.msk.bf16.gmra.mxu0 %vm491_vm1, %v5627_v63  ;;  %v3151_v63 = vshrl.u32 %v5801_v39, 16  ;;  %v3140_v62 = vsel %vm3060_vm6, %v3130_v8, %v3139_v37 }
 0x125   : > { %v885_v27 = vadd.f32 %v884_v53, %v5901_v14  ;;  %v6010_v45 = vadd.f32 %v4615_v24, %v890_v49  ;;  %4869 = vmatprep.mubr.msk.bf16.mxu0 %vm491_vm1, %v5649_v43  ;;  %v3154_v14 = vshll.u32 %v5801_v39, 16  ;;  %v3160_v43 = vshrl.u32 %v5809_v51, 16 }
 0x126   : > { %v4575_v60 = vpop.f32.mrf.mxu1  ;;  %4826 = vmatmul.mubr.msk.bf16.gmra.mxu1 %vm491_vm1, %v3122_v29  ;;  %v1186_v54 = vpop.f32.mrf.mxu0  ;;  %v6555_v49 = vrot.slane %v5640_v9, 3  ;;  %v3153_v55 = vrot.slane %v3151_v63, 2  ;;  %v3149_v30 = vsel %vm3060_vm6, %v3139_v37, %v3148_v31  ;;  %v3552_v53 = vrot.slane %v5777_v32, 3  ;;  %v6557_v63 = vld [vmem:[#allocation2_spill] sm:$0xff] }
 0x127   : > { %v6016_v18 = vadd.f32 %v1186_v54, %v882_v17  ;;  %4829 = vmatprep.mubr.msk.bf16.mxu1 %vm491_vm1, %v3131_v23  ;;  %v906_v3 = vadd.f32 %v4575_v60, %v5754_v56  ;;  %v3156_v21 = vrot.slane %v3154_v14, 3  ;;  %v3162_v11 = vrot.slane %v3160_v43, 2  ;;  %v6556_v60 = vld [vmem:[#allocation10_spill] sm:$0xff] }
 0x128   : > { %v897_v25 = vpop.f32.mrf.mxu1  ;;  %v4616_v52 = vpop.f32.mrf.mxu0  ;;  %v3549_v46 = vsel %vm3534_vm5, %v6555_v49, %v3548_v35  ;;  %v3550_v56 = vrot.slane %v5769_v5, 3  ;;  %v3172_v24 = vshll.u32 %v5833_v59, 16  ;;  %v3178_v54 = vshrl.u32 %v6556_v60, 16 }
 0x129   : > { %v6023_v28 = vadd.f32 %v4616_v52, %v893_v38  ;;  %v898_v8 = vadd.f32 %v897_v25, %v5763_v33  ;;  %v3157_v33 = vor.u32 %v3156_v21, %v3153_v55  ;;  %v3166_v5 = vor.u32 %v3165_v26, %v3162_v11 }
 0x12a   : > { %v4576_v48 = vpop.f32.mrf.mxu1  ;;  %v1189_v10 = vpop.f32.mrf.mxu0  ;;  %v3181_v37 = vshll.u32 %v6556_v60, 16  ;;  %v3551_v25 = vsel %vm3534_vm5, %v3548_v35, %v3550_v56  ;;  %v3553_v43 = vsel %vm3534_vm5, %v3550_v56, %v3552_v53  ;;  %v3554_v26 = vrot.slane %v5801_v39, 3 }
 0x12b   : > { %v6030_v36 = vadd.f32 %v1189_v10, %v885_v27  ;;  %v909_v23 = vadd.f32 %v4576_v48, %v5771_v13  ;;  %v3174_v48 = vrot.slane %v3172_v24, 3  ;;  %v6558_v10 = vld [vmem:[#allocation3_spill] sm:$0xff]  ;;  %v3167_v21 = vsel %vm3060_vm6, %v3157_v33, %v3166_v5 }
 0x12c   : > { %v900_v17 = vpop.f32.mrf.mxu1  ;;  %v4619_v57 = vpop.f32.mrf.mxu0  ;;  %4870 = vmatmul.mubr.msk.bf16.gmra.mxu0 %vm491_vm1, %v5657_v19  ;;  %v3169_v19 = vshrl.u32 %v5833_v59, 16  ;;  %v3183_v35 = vrot.slane %v3181_v37, 3  ;;  %v6562_v37 = vld [vmem:[#allocation16_spill] sm:$0xff] }
 0x12d   : > { %v6036_v9 = vadd.f32 %v4619_v57, %v906_v3  ;;  %4873 = vmatprep.mubr.msk.bf16.mxu0 %vm491_vm1, %v3549_v46  ;;  %v901_v32 = vadd.f32 %v900_v17, %v6557_v63  ;;  %v3158_v46 = vsel %vm3060_vm6, %v3148_v31, %v3157_v33  ;;  %v3180_v17 = vrot.slane %v3178_v54, 2  ;;  %v6559_v57 = vld [vmem:[#allocation4_spill] sm:$0xff] }
 0x12e   : > { %v4579_v38 = vpop.f32.mrf.mxu1  ;;  %4830 = vmatmul.mubr.msk.bf16.gmra.mxu1 %vm491_vm1, %v3140_v62  ;;  %v1202_v29 = vpop.f32.mrf.mxu0  ;;  %v3171_v12 = vrot.slane %v3169_v19, 2  ;;  %v3196_v63 = vshrl.u32 %v6562_v37, 16 }
 0x12f   : > { %v6045_v44 = vadd.f32 %v1202_v29, %v898_v8  ;;  %4833 = vmatprep.mubr.msk.bf16.mxu1 %vm491_vm1, %v3149_v30  ;;  %v922_v62 = vadd.f32 %v4579_v38, %v6558_v10  ;;  %v3556_v38 = vrot.slane %v5809_v51, 3  ;;  %v6560_v29 = vld [vmem:[#allocation5_spill] sm:$0xff]  ;;  %v3184_v39 = vor.u32 %v3183_v35, %v3180_v17 }
 0x130   : > { %v913_v16 = vpop.f32.mrf.mxu1  ;;  %v4620_v27 = vpop.f32.mrf.mxu0  ;;  %v3175_v56 = vor.u32 %v3174_v48, %v3171_v12 }
 0x131   : > { %v6051_v14 = vadd.f32 %v4620_v27, %v909_v23  ;;  %v914_v30 = vadd.f32 %v913_v16, %v6559_v57  ;;  %v6561_v23 = vld [vmem:[#allocation14_spill] sm:$0xff]  ;;  %v3557_v10 = vsel %vm3534_vm5, %v3554_v26, %v3556_v38 }
 0x132   : > { %v4580_v52 = vpop.f32.mrf.mxu1  ;;  %v1205_v13 = vpop.f32.mrf.mxu0  ;;  %v3187_v33 = vshrl.u32 %v6561_v23, 16  ;;  %v3190_v16 = vshll.u32 %v6561_v23, 16  ;;  %v3176_v48 = vsel %vm3060_vm6, %v3166_v5, %v3175_v56  ;;  %v3558_v5 = vrot.slane %v5833_v59, 3 }
 0x133   : > { %v6056_v49 = vadd.f32 %v1205_v13, %v901_v32  ;;  %v925_v19 = vadd.f32 %v4580_v52, %v6560_v29  ;;  %v3199_v32 = vshll.u32 %v6562_v37, 16  ;;  %v3555_v52 = vsel %vm3534_vm5, %v3552_v53, %v3554_v26 }
 0x134   : > { %v916_v3 = vpop.f32.mrf.mxu1  ;;  %v4623_v55 = vpop.f32.mrf.mxu0  ;;  %4874 = vmatmul.mubr.msk.bf16.gmra.mxu0 %vm491_vm1, %v3551_v25  ;;  %v6563_v25 = vld [vmem:[#allocation6_spill] sm:$0xff]  ;;  %v3192_v17 = vrot.slane %v3190_v16, 3  ;;  %v3205_v16 = vshrl.u32 %v5899_v50, 16 }
 0x135   : > { %v6062_v11 = vadd.f32 %v4623_v55, %v922_v62  ;;  %4877 = vmatprep.mubr.msk.bf16.mxu0 %vm491_vm1, %v3553_v43  ;;  %v917_v13 = vadd.f32 %v916_v3, %v6563_v25  ;;  %v6564_v62 = vld [vmem:[#allocation7_spill] sm:$0xff]  ;;  %v3185_v3 = vsel %vm3060_vm6, %v3175_v56, %v3184_v39  ;;  %v3201_v53 = vrot.slane %v3199_v32, 3 }
 0x136   : > { %v4583_v8 = vpop.f32.mrf.mxu1  ;;  %4834 = vmatmul.mubr.msk.bf16.gmra.mxu1 %vm491_vm1, %v3158_v46  ;;  %v1218_v31 = vpop.f32.mrf.mxu0  ;;  %v3208_v56 = vshll.u32 %v5899_v50, 16 }
 0x137   : > { %v6069_v24 = vadd.f32 %v1218_v31, %v914_v30  ;;  %4837 = vmatprep.mubr.msk.bf16.mxu1 %vm491_vm1, %v3167_v21  ;;  %v938_v46 = vadd.f32 %v4583_v8, %v6564_v62  ;;  %v3189_v21 = vrot.slane %v3187_v33, 2  ;;  %v3198_v30 = vrot.slane %v3196_v63, 2  ;;  %v6565_v31 = vld [vmem:[#allocation8_spill] sm:$0xff] }
 0x138   : > { %v929_v27 = vpop.f32.mrf.mxu1  ;;  %v4624_v54 = vpop.f32.mrf.mxu0  ;;  %v3560_v33 = vrot.slane %v6556_v60, 3  ;;  %v6567_v60 = vld [vmem:[#allocation11_spill] sm:$0xff]  ;;  %v3559_v62 = vsel %vm3534_vm5, %v3556_v38, %v3558_v5 }
 0x139   : > { %v6077_v51 = vadd.f32 %v4624_v54, %v925_v19  ;;  %v930_v29 = vadd.f32 %v929_v27, %v6565_v31  ;;  %v6566_v54 = vld [vmem:[#allocation9_spill] sm:$0xff]  ;;  %v3193_v27 = vor.u32 %v3192_v17, %v3189_v21  ;;  %v3207_v31 = vrot.slane %v3205_v16, 2  ;;  %v6108_v21 = vld [vmem:[%s5067_s25 + $0xa0] ss:$0 sps:$4 sm:$0x77]   ;;  %v6568_v17 = vld [vmem:[#allocation12_spill] sm:$0xff] }
 0x13a   : > { %v4584_v43 = vpop.f32.mrf.mxu1  ;;  %v1221_v12 = vpop.f32.mrf.mxu0  ;;  %s4906_s25 = smul.u32 288, %s6574_s13 }
 0x13b   : > { %v6083_v55 = vadd.f32 %v1221_v12, %v917_v13  ;;  %v941_v63 = vadd.f32 %v4584_v43, %v6566_v54  ;;  %v3202_v13 = vor.u32 %v3201_v53, %v3198_v30  ;;  %v3217_v12 = vshll.u32 %v5905_v4, 16 }
 0x13c   : > { %v932_v35 = vpop.f32.mrf.mxu1  ;;  %v4627_v57 = vpop.f32.mrf.mxu0  ;;  %4878 = vmatmul.mubr.msk.bf16.gmra.mxu0 %vm491_vm1, %v3555_v52  ;;  %v3214_v52 = vshrl.u32 %v5905_v4, 16  ;;  %s6382_s13 = scalar_lea.vmem %s6530_s3, %s4906_s25 }
 0x13d   : > { %v6088_v19 = vadd.f32 %v4627_v57, %v938_v46  ;;  %4881 = vmatprep.mubr.msk.bf16.mxu0 %vm491_vm1, %v3557_v10  ;;  %v3561_v57 = vsel %vm3534_vm5, %v3558_v5, %v3560_v33  ;;  %v3203_v38 = vsel %vm3060_vm6, %v3193_v27, %v3202_v13 }
 0x13e   : > { %v4587_v26 = vpop.f32.mrf.mxu1  ;;  %4838 = vmatmul.mubr.msk.bf16.gmra.mxu1 %vm491_vm1, %v3176_v48  ;;  %v1234_v8 = vpop.f32.mrf.mxu0  ;;  %v933_v48 = vadd.f32 %v932_v35, %v6567_v60  ;;  %v3216_v54 = vrot.slane %v3214_v52, 2 }
 0x13f   : > { %v6097_v32 = vadd.f32 %v1234_v8, %v930_v29  ;;  %4841 = vmatprep.mubr.msk.bf16.mxu1 %vm491_vm1, %v3185_v3  ;;  %v3210_v3 = vrot.slane %v3208_v56, 3  ;;  %v954_v30 = vadd.f32 %v4587_v26, %v6568_v17  ;;  %v3194_v29 = vsel %vm3060_vm6, %v3184_v39, %v3193_v27  ;;  %v6570_v27 = vld [vmem:[#allocation15_spill] sm:$0xff] }
 0x140   : > { %v945_v25 = vpop.f32.mrf.mxu1  ;;  %v4628_v59 = vpop.f32.mrf.mxu0  ;;  %v3562_v26 = vrot.slane %v6561_v23, 3 }
 0x141   : > { %v6103_v10 = vadd.f32 %v4628_v59, %v941_v63  ;;  %v3219_v63 = vrot.slane %v3217_v12, 3  ;;  %v6569_v59 = vld [vmem:[#allocation13_spill] sm:$0xff]  ;;  %v3211_v60 = vor.u32 %v3210_v3, %v3207_v31  ;;  %v6572_v31 = vld [vmem:[#allocation18_spill] sm:$0xff] }
 0x142   : > { %v4588_v43 = vpop.f32.mrf.mxu1  ;;  %v1237_v46 = vpop.f32.mrf.mxu0  ;;  %v946_v5 = vadd.f32 %v945_v25, %v6569_v59 }
 0x143   : > { %v6111_v53 = vadd.f32 %v1237_v46, %v933_v48  ;;  %v3564_v48 = vrot.slane %v6562_v37, 3  ;;  %v957_v52 = vadd.f32 %v4588_v43, %v6570_v27  ;;  %v3226_v46 = vshll.u32 %v6108_v21, 16 }
 0x144   : > { %v948_v8 = vpop.f32.mrf.mxu1  ;;  %v4631_v35 = vpop.f32.mrf.mxu0  ;;  %4882 = vmatmul.mubr.msk.bf16.gmra.mxu0 %vm491_vm1, %v3559_v62  ;;  %v3223_v62 = vshrl.u32 %v6108_v21, 16  ;;  %v3220_v17 = vor.u32 %v3219_v63, %v3216_v54 }
 0x145   : > { %v6117_v16 = vadd.f32 %v4631_v35, %v954_v30  ;;  %4885 = vmatprep.mubr.msk.bf16.mxu0 %vm491_vm1, %v3561_v57  ;;  %v6571_v30 = vld [vmem:[#allocation17_spill] sm:$0xff]  ;;  %v3563_v35 = vsel %vm3534_vm5, %v3560_v33, %v3562_v26  ;;  %v3228_v54 = vrot.slane %v3226_v46, 3 }
 0x146   : > { %v4643_v56 = vpop.f32.mrf.mxu1  ;;  %4842 = vmatmul.mubr.msk.bf16.gmra.mxu1 %vm491_vm1, %v3194_v29  ;;  %v1250_v39 = vpop.f32.mrf.mxu0  ;;  %v949_v29 = vadd.f32 %v948_v8, %v6571_v30  ;;  %v3221_v27 = vsel %vm3060_vm6, %v3211_v60, %v3220_v17 }
 0x147   : > { %v1733_v12 = vadd.f32 %v4643_v56, %v5910_v47  ;;  %v6126_v25 = vadd.f32 %v1250_v39, %v946_v5  ;;  %4845 = vmatprep.mubr.msk.bf16.mxu1 %vm491_vm1, %v3203_v38  ;;  %v3212_v47 = vsel %vm3060_vm6, %v3202_v13, %v3211_v60  ;;  %v3565_v5 = vsel %vm3534_vm5, %v3562_v26, %v3564_v48 }
 0x148   : > { %v1588_v23 = vpop.f32.mrf.mxu1  ;;  %v4632_v57 = vpop.f32.mrf.mxu0  ;;  %v3225_v39 = vrot.slane %v3223_v62, 2  ;;  %v3566_v13 = vrot.slane %v5899_v50, 3  ;;  %v3568_v62 = vrot.slane %v5905_v4, 3 }
 0x149   : > { %v1731_v3 = vadd.f32 %v1588_v23, %v6572_v31  ;;  %v6132_v37 = vadd.f32 %v4632_v57, %v957_v52 }
 0x14a   : > { %v4644_v43 = vpop.f32.mrf.mxu1  ;;  %v1253_v59 = vpop.f32.mrf.mxu0  ;;  %v3229_v60 = vor.u32 %v3228_v54, %v3225_v39  ;;  %v3567_v50 = vsel %vm3534_vm5, %v3564_v48, %v3566_v13  ;;  %v3570_v48 = vrot.slane %v6108_v21, 3 }
 0x14b   : > { %v1734_v38 = vadd.f32 %v4644_v43, %v5927_v34  ;;  %v6138_v56 = vadd.f32 %v1253_v59, %v949_v29 }
 0x14c   : > { %v1591_v63 = vpop.f32.mrf.mxu1  ;;  %v4687_v8 = vpop.f32.mrf.mxu0  ;;  %4886 = vmatmul.mubr.msk.bf16.gmra.mxu0 %vm491_vm1, %v3563_v35  ;;  %v3569_v35 = vsel %vm3534_vm5, %v3566_v13, %v3568_v62 }
 0x14d   : > { %v1732_v33 = vadd.f32 %v1591_v63, %v5933_v41  ;;  %v6143_v52 = vadd.f32 %v4687_v8, %v1733_v12  ;;  %4889 = vmatprep.mubr.msk.bf16.mxu0 %vm491_vm1, %v3565_v5 }
 0x14e   : > { %v4647_v26 = vpop.f32.mrf.mxu1  ;;  %4846 = vmatmul.mubr.msk.bf16.gmra.mxu1 %vm491_vm1, %v3212_v47  ;;  %v2062_v34 = vpop.f32.mrf.mxu0 }
 0x14f   : > { %v1737_v46 = vadd.f32 %v4647_v26, %v5938_v0  ;;  %v6150_v23 = vadd.f32 %v2062_v34, %v1731_v3  ;;  %4849 = vmatprep.mubr.msk.bf16.mxu1 %vm491_vm1, %v3221_v27  ;;  %v3230_v3 = vsel %vm3060_vm6, %v3220_v17, %v3229_v60 }
 0x150   : > { %v1604_v41 = vpop.f32.mrf.mxu1  ;;  %v4688_v12 = vpop.f32.mrf.mxu0 }
 0x151   : > { %v1735_v57 = vadd.f32 %v1604_v41, %v5946_v6  ;;  %v6154_v30 = vadd.f32 %v4688_v12, %v1734_v38 }
 0x152   : > { %v4648_v29 = vpop.f32.mrf.mxu1  ;;  %v2065_v31 = vpop.f32.mrf.mxu0 }
 0x153   : > { %v1738_v4 = vadd.f32 %v4648_v29, %v5952_v40  ;;  %v6159_v0 = vadd.f32 %v2065_v31, %v1732_v33 }
 0x154   : > { %v1607_v43 = vpop.f32.mrf.mxu1  ;;  %v4691_v59 = vpop.f32.mrf.mxu0  ;;  %4890 = vmatmul.mubr.msk.bf16.gmra.mxu0 %vm491_vm1, %v3567_v50 }
 0x155   : > { %v1736_v6 = vadd.f32 %v1607_v43, %v5956_v2  ;;  %v6164_v47 = vadd.f32 %v4691_v59, %v1737_v46  ;;  %4893 = vmatprep.mubr.msk.bf16.mxu0 %vm491_vm1, %v3569_v35  ;;  %v3571_v2 = vsel %vm3534_vm5, %v3568_v62, %v3570_v48 }
 0x156   : > { %v4651_v5 = vpop.f32.mrf.mxu1  ;;  %4850 = vmatmul.mubr.msk.bf16.gmra.mxu1 %vm491_vm1, %v3230_v3  ;;  %v2078_v40 = vpop.f32.mrf.mxu0 }
 0x157   : > { %v1741_v38 = vadd.f32 %v4651_v5, %v5962_v22  ;;  %v6170_v39 = vadd.f32 %v2078_v40, %v1735_v57 }
 0x158   : > { %v1620_v17 = vpop.f32.mrf.mxu1  ;;  %v4692_v54 = vpop.f32.mrf.mxu0 }
 0x159   : > { %v1739_v63 = vadd.f32 %v1620_v17, %v5968_v61  ;;  %v6173_v8 = vadd.f32 %v4692_v54, %v1738_v4 }
 0x15a   : > { %v4652_v27 = vpop.f32.mrf.mxu1  ;;  %v2081_v33 = vpop.f32.mrf.mxu0 }
 0x15b   : > { %v1742_v21 = vadd.f32 %v4652_v27, %v5976_v58  ;;  %v6177_v13 = vadd.f32 %v2081_v33, %v1736_v6 }
 0x15c   : > { %v1623_v26 = vpop.f32.mrf.mxu1  ;;  %v4695_v34 = vpop.f32.mrf.mxu0  ;;  %4894 = vmatmul.mubr.msk.bf16.gmra.mxu0 %vm491_vm1, %v3571_v2 }
 0x15d   : > { %v1740_v22 = vadd.f32 %v1623_v26, %v5980_v1  ;;  %v6181_v46 = vadd.f32 %v4695_v34, %v1741_v38 }
 0x15e   : > { %v4655_v60 = vpop.f32.mrf.mxu1  ;;  %v2094_v61 = vpop.f32.mrf.mxu0 }
 0x15f   : > { %v1745_v41 = vadd.f32 %v4655_v60, %v5986_v42  ;;  %v6184_v12 = vadd.f32 %v2094_v61, %v1739_v63 }
 0x160   : > { %v1636_v62 = vpop.f32.mrf.mxu1  ;;  %v4696_v57 = vpop.f32.mrf.mxu0 }
 0x161   : > { %v1743_v58 = vadd.f32 %v1636_v62, %v5994_v15  ;;  %v6187_v50 = vadd.f32 %v4696_v57, %v1742_v21 }
 0x162   : > { %v4656_v29 = vpop.f32.mrf.mxu1  ;;  %v2097_v31 = vpop.f32.mrf.mxu0 }
 0x163   : > { %v1746_v35 = vadd.f32 %v4656_v29, %v6000_v20  ;;  %v6190_v4 = vadd.f32 %v2097_v31, %v1740_v22 }
 0x164   : > { %v1639_v1 = vpop.f32.mrf.mxu1  ;;  %v4699_v3 = vpop.f32.mrf.mxu0 }
 0x165   : > { %v1744_v43 = vadd.f32 %v1639_v1, %v6003_v7  ;;  %v6193_v59 = vadd.f32 %v4699_v3, %v1745_v41 }
 0x166   : > { %v4659_v42 = vpop.f32.mrf.mxu1  ;;  %v2110_v6 = vpop.f32.mrf.mxu0 }
 0x167   : > { %v1749_v48 = vadd.f32 %v4659_v42, %v6010_v45  ;;  %v6196_v5 = vadd.f32 %v2110_v6, %v1743_v58 }
 0x168   : > { %v1652_v15 = vpop.f32.mrf.mxu1  ;;  %v4700_v40 = vpop.f32.mrf.mxu0 }
 0x169   : > { %v1747_v38 = vadd.f32 %v1652_v15, %v6016_v18  ;;  %v6199_v17 = vadd.f32 %v4700_v40, %v1746_v35 }
 0x16a   : > { %v4660_v20 = vpop.f32.mrf.mxu1  ;;  %v2113_v54 = vpop.f32.mrf.mxu0 }
 0x16b   : > { %v1750_v63 = vadd.f32 %v4660_v20, %v6023_v28  ;;  %v6202_v2 = vadd.f32 %v2113_v54, %v1744_v43 }
 0x16c   : > { %v1655_v7 = vpop.f32.mrf.mxu1  ;;  %v4703_v27 = vpop.f32.mrf.mxu0 }
 0x16d   : > { %v1748_v33 = vadd.f32 %v1655_v7, %v6030_v36  ;;  %v6205_v21 = vadd.f32 %v4703_v27, %v1749_v48 }
 0x16e   : > { %v4663_v45 = vpop.f32.mrf.mxu1  ;;  %v2126_v26 = vpop.f32.mrf.mxu0 }
 0x16f   : > { %v1753_v34 = vadd.f32 %v4663_v45, %v6036_v9  ;;  %v6208_v22 = vadd.f32 %v2126_v26, %v1747_v38 }
 0x170   : > { %v1668_v18 = vpop.f32.mrf.mxu1  ;;  %v4704_v60 = vpop.f32.mrf.mxu0 }
 0x171   : > { %v1751_v61 = vadd.f32 %v1668_v18, %v6045_v44  ;;  %v6211_v41 = vadd.f32 %v4704_v60, %v1750_v63 }
 0x172   : > { %v4664_v28 = vpop.f32.mrf.mxu1  ;;  %v2129_v62 = vpop.f32.mrf.mxu0 }
 0x173   : > { %v1754_v57 = vadd.f32 %v4664_v28, %v6051_v14  ;;  %v6214_v58 = vadd.f32 %v2129_v62, %v1748_v33 }
 0x174   : > { %v1671_v36 = vpop.f32.mrf.mxu1  ;;  %v4707_v29 = vpop.f32.mrf.mxu0 }
 0x175   : > { %v1752_v31 = vadd.f32 %v1671_v36, %v6056_v49  ;;  %v6217_v35 = vadd.f32 %v4707_v29, %v1753_v34 }
 0x176   : > { %v4667_v9 = vpop.f32.mrf.mxu1  ;;  %v2142_v1 = vpop.f32.mrf.mxu0 }
 0x177   : > { %v1757_v3 = vadd.f32 %v4667_v9, %v6062_v11  ;;  %v6220_v43 = vadd.f32 %v2142_v1, %v1751_v61 }
 0x178   : > { %v1684_v44 = vpop.f32.mrf.mxu1  ;;  %v4708_v42 = vpop.f32.mrf.mxu0 }
 0x179   : > { %v1755_v6 = vadd.f32 %v1684_v44, %v6069_v24  ;;  %v6223_v48 = vadd.f32 %v4708_v42, %v1754_v57 }
 0x17a   : > { %v4668_v14 = vpop.f32.mrf.mxu1  ;;  %v2145_v15 = vpop.f32.mrf.mxu0 }
 0x17b   : > { %v1758_v40 = vadd.f32 %v4668_v14, %v6077_v51  ;;  %v6226_v38 = vadd.f32 %v2145_v15, %v1752_v31 }
 0x17c   : > { %v1687_v49 = vpop.f32.mrf.mxu1  ;;  %v4711_v20 = vpop.f32.mrf.mxu0 }
 0x17d   : > { %v1756_v54 = vadd.f32 %v1687_v49, %v6083_v55  ;;  %v6229_v63 = vadd.f32 %v4711_v20, %v1757_v3 }
 0x17e   : > { %v4671_v11 = vpop.f32.mrf.mxu1  ;;  %v2158_v7 = vpop.f32.mrf.mxu0 }
 0x17f   : > { %v1761_v27 = vadd.f32 %v4671_v11, %v6088_v19  ;;  %v6232_v33 = vadd.f32 %v2158_v7, %v1755_v6 }
 0x180   : > { %v1700_v24 = vpop.f32.mrf.mxu1  ;;  %v4712_v45 = vpop.f32.mrf.mxu0 }
 0x181   : > { %v1759_v26 = vadd.f32 %v1700_v24, %v6097_v32  ;;  %v6235_v34 = vadd.f32 %v4712_v45, %v1758_v40 }
 0x182   : > { %v4672_v51 = vpop.f32.mrf.mxu1  ;;  %v2161_v18 = vpop.f32.mrf.mxu0 }
 0x183   : > { %v1762_v60 = vadd.f32 %v4672_v51, %v6103_v10  ;;  %v6238_v61 = vadd.f32 %v2161_v18, %v1756_v54 }
 0x184   : > { %v1703_v55 = vpop.f32.mrf.mxu1  ;;  %v4715_v28 = vpop.f32.mrf.mxu0 }
 0x185   : > { %v1760_v62 = vadd.f32 %v1703_v55, %v6111_v53  ;;  %v6241_v57 = vadd.f32 %v4715_v28, %v1761_v27 }
 0x186   : > { %v4675_v19 = vpop.f32.mrf.mxu1  ;;  %v2174_v36 = vpop.f32.mrf.mxu0 }
 0x187   : > { %v1765_v29 = vadd.f32 %v4675_v19, %v6117_v16  ;;  %v6244_v31 = vadd.f32 %v2174_v36, %v1759_v26 }
 0x188   : > { %v1716_v32 = vpop.f32.mrf.mxu1  ;;  %v4716_v9 = vpop.f32.mrf.mxu0 }
 0x189   : > { %v1763_v1 = vadd.f32 %v1716_v32, %v6126_v25  ;;  %v6247_v3 = vadd.f32 %v4716_v9, %v1762_v60 }
 0x18a   : > { %v4676_v10 = vpop.f32.mrf.mxu1  ;;  %v2177_v44 = vpop.f32.mrf.mxu0 }
 0x18b   : > { %v1766_v42 = vadd.f32 %v4676_v10, %v6132_v37  ;;  %v6250_v6 = vadd.f32 %v2177_v44, %v1760_v62 }
 0x18c   : > { %v1719_v53 = vpop.f32.mrf.mxu1  ;;  %v4719_v14 = vpop.f32.mrf.mxu0 }
 0x18d   : > { %v1764_v15 = vadd.f32 %v1719_v53, %v6138_v56  ;;  %v6253_v40 = vadd.f32 %v4719_v14, %v1765_v29 }
 0x18e   : > { %v4731_v16 = vpop.f32.mrf.mxu1  ;;  %v2190_v49 = vpop.f32.mrf.mxu0 }
 0x18f   : > { %v2548_v20 = vadd.f32 %v4731_v16, %v6143_v52  ;;  %v6256_v54 = vadd.f32 %v2190_v49, %v1763_v1 }
 0x190   : > { %v2403_v25 = vpop.f32.mrf.mxu1  ;;  %v4720_v11 = vpop.f32.mrf.mxu0 }
 0x191   : > { %v2546_v7 = vadd.f32 %v2403_v25, %v6150_v23  ;;  %v6259_v27 = vadd.f32 %v4720_v11, %v1766_v42 }
 0x192   : > { %v4732_v37 = vpop.f32.mrf.mxu1  ;;  %v2193_v24 = vpop.f32.mrf.mxu0 }
 0x193   : > { %v2549_v45 = vadd.f32 %v4732_v37, %v6154_v30  ;;  %v6262_v26 = vadd.f32 %v2193_v24, %v1764_v15 }
 0x194   : > { %v2406_v56 = vpop.f32.mrf.mxu1  ;;  %v4775_v51 = vpop.f32.mrf.mxu0 }
 0x195   : > { %v2547_v18 = vadd.f32 %v2406_v56, %v6159_v0  ;;  %v6265_v60 = vadd.f32 %v4775_v51, %v2548_v20 }
 0x196   : > { %v4735_v52 = vpop.f32.mrf.mxu1  ;;  %v2869_v55 = vpop.f32.mrf.mxu0 }
 0x197   : > { %v2552_v28 = vadd.f32 %v4735_v52, %v6164_v47  ;;  %v6268_v62 = vadd.f32 %v2869_v55, %v2546_v7 }
 0x198   : > { %v2419_v23 = vpop.f32.mrf.mxu1  ;;  %v4776_v19 = vpop.f32.mrf.mxu0 }
 0x199   : > { %v2550_v36 = vadd.f32 %v2419_v23, %v6170_v39  ;;  %v6271_v29 = vadd.f32 %v4776_v19, %v2549_v45 }
 0x19a   : > { %v4736_v30 = vpop.f32.mrf.mxu1  ;;  %v2872_v32 = vpop.f32.mrf.mxu0 }
 0x19b   : > { %v2553_v9 = vadd.f32 %v4736_v30, %v6173_v8  ;;  %v6274_v1 = vadd.f32 %v2872_v32, %v2547_v18 }
 0x19c   : > { %v2422_v0 = vpop.f32.mrf.mxu1  ;;  %v4779_v10 = vpop.f32.mrf.mxu0 }
 0x19d   : > { %v2551_v44 = vadd.f32 %v2422_v0, %v6177_v13  ;;  %v6277_v42 = vadd.f32 %v4779_v10, %v2552_v28 }
 0x19e   : > { %v4739_v47 = vpop.f32.mrf.mxu1  ;;  %v2885_v53 = vpop.f32.mrf.mxu0 }
 0x19f   : > { %v2556_v14 = vadd.f32 %v4739_v47, %v6181_v46  ;;  %v6280_v15 = vadd.f32 %v2885_v53, %v2550_v36 }
 0x1a0   : > { %v2435_v39 = vpop.f32.mrf.mxu1  ;;  %v4780_v16 = vpop.f32.mrf.mxu0 }
 0x1a1   : > { %v2554_v49 = vadd.f32 %v2435_v39, %v6184_v12  ;;  %v6283_v20 = vadd.f32 %v4780_v16, %v2553_v9 }
 0x1a2   : > { %v4740_v8 = vpop.f32.mrf.mxu1  ;;  %v2888_v25 = vpop.f32.mrf.mxu0 }
 0x1a3   : > { %v2557_v11 = vadd.f32 %v4740_v8, %v6187_v50  ;;  %v6286_v7 = vadd.f32 %v2888_v25, %v2551_v44 }
 0x1a4   : > { %v2438_v13 = vpop.f32.mrf.mxu1  ;;  %v4783_v37 = vpop.f32.mrf.mxu0 }
 0x1a5   : > { %v2555_v24 = vadd.f32 %v2438_v13, %v6190_v4  ;;  %v6289_v45 = vadd.f32 %v4783_v37, %v2556_v14 }
 0x1a6   : > { %v4743_v46 = vpop.f32.mrf.mxu1  ;;  %v2901_v56 = vpop.f32.mrf.mxu0 }
 0x1a7   : > { %v2560_v51 = vadd.f32 %v4743_v46, %v6193_v59  ;;  %v6292_v18 = vadd.f32 %v2901_v56, %v2554_v49 }
 0x1a8   : > { %v2451_v12 = vpop.f32.mrf.mxu1  ;;  %v4784_v52 = vpop.f32.mrf.mxu0 }
 0x1a9   : > { %v2558_v55 = vadd.f32 %v2451_v12, %v6196_v5  ;;  %v6295_v28 = vadd.f32 %v4784_v52, %v2557_v11 }
 0x1aa   : > { %v4744_v50 = vpop.f32.mrf.mxu1  ;;  %v2904_v23 = vpop.f32.mrf.mxu0 }
 0x1ab   : > { %v2561_v19 = vadd.f32 %v4744_v50, %v6199_v17  ;;  %v6298_v36 = vadd.f32 %v2904_v23, %v2555_v24 }
 0x1ac   : > { %v2454_v4 = vpop.f32.mrf.mxu1  ;;  %v4787_v30 = vpop.f32.mrf.mxu0 }
 0x1ad   : > { %v2559_v32 = vadd.f32 %v2454_v4, %v6202_v2  ;;  %v6301_v9 = vadd.f32 %v4787_v30, %v2560_v51 }
 0x1ae   : > { %v4747_v59 = vpop.f32.mrf.mxu1  ;;  %v2917_v0 = vpop.f32.mrf.mxu0 }
 0x1af   : > { %v2564_v10 = vadd.f32 %v4747_v59, %v6205_v21  ;;  %v6304_v44 = vadd.f32 %v2917_v0, %v2558_v55 }
 0x1b0   : > { %v2467_v5 = vpop.f32.mrf.mxu1  ;;  %v4788_v47 = vpop.f32.mrf.mxu0 }
 0x1b1   : > { %v2562_v53 = vadd.f32 %v2467_v5, %v6208_v22  ;;  %v6307_v14 = vadd.f32 %v4788_v47, %v2561_v19 }
 0x1b2   : > { %v4748_v17 = vpop.f32.mrf.mxu1  ;;  %v2920_v39 = vpop.f32.mrf.mxu0 }
 0x1b3   : > { %v2565_v16 = vadd.f32 %v4748_v17, %v6211_v41  ;;  %v6310_v49 = vadd.f32 %v2920_v39, %v2559_v32 }
 0x1b4   : > { %v2470_v2 = vpop.f32.mrf.mxu1  ;;  %v4791_v8 = vpop.f32.mrf.mxu0 }
 0x1b5   : > { %v2563_v25 = vadd.f32 %v2470_v2, %v6214_v58  ;;  %v6313_v11 = vadd.f32 %v4791_v8, %v2564_v10 }
 0x1b6   : > { %v4751_v21 = vpop.f32.mrf.mxu1  ;;  %v2933_v13 = vpop.f32.mrf.mxu0 }
 0x1b7   : > { %v2568_v37 = vadd.f32 %v4751_v21, %v6217_v35  ;;  %v6316_v24 = vadd.f32 %v2933_v13, %v2562_v53 }
 0x1b8   : > { %v2483_v22 = vpop.f32.mrf.mxu1  ;;  %v4792_v46 = vpop.f32.mrf.mxu0 }
 0x1b9   : > { %v2566_v56 = vadd.f32 %v2483_v22, %v6220_v43  ;;  %v6319_v51 = vadd.f32 %v4792_v46, %v2565_v16 }
 0x1ba   : > { %v4752_v41 = vpop.f32.mrf.mxu1  ;;  %v2936_v12 = vpop.f32.mrf.mxu0 }
 0x1bb   : > { %v2569_v52 = vadd.f32 %v4752_v41, %v6223_v48  ;;  %v6322_v55 = vadd.f32 %v2936_v12, %v2563_v25 }
 0x1bc   : > { %v2486_v58 = vpop.f32.mrf.mxu1  ;;  %v4795_v50 = vpop.f32.mrf.mxu0 }
 0x1bd   : > { %v2567_v23 = vadd.f32 %v2486_v58, %v6226_v38  ;;  %v6325_v19 = vadd.f32 %v4795_v50, %v2568_v37 }
 0x1be   : > { %v4755_v35 = vpop.f32.mrf.mxu1  ;;  %v2949_v4 = vpop.f32.mrf.mxu0 }
 0x1bf   : > { %v2572_v30 = vadd.f32 %v4755_v35, %v6229_v63  ;;  %v6328_v32 = vadd.f32 %v2949_v4, %v2566_v56 }
 0x1c0   : > { %v2499_v43 = vpop.f32.mrf.mxu1  ;;  %v4796_v59 = vpop.f32.mrf.mxu0 }
 0x1c1   : > { %v2570_v0 = vadd.f32 %v2499_v43, %v6232_v33  ;;  %v6331_v10 = vadd.f32 %v4796_v59, %v2569_v52 }
 0x1c2   : > { %v4756_v48 = vpop.f32.mrf.mxu1  ;;  %v2952_v5 = vpop.f32.mrf.mxu0 }
 0x1c3   : > { %v2573_v47 = vadd.f32 %v4756_v48, %v6235_v34  ;;  %v6334_v53 = vadd.f32 %v2952_v5, %v2567_v23 }
 0x1c4   : > { %v2502_v38 = vpop.f32.mrf.mxu1  ;;  %v4799_v17 = vpop.f32.mrf.mxu0 }
 0x1c5   : > { %v2571_v39 = vadd.f32 %v2502_v38, %v6238_v61  ;;  %v6337_v16 = vadd.f32 %v4799_v17, %v2572_v30 }
 0x1c6   : > { %v4759_v63 = vpop.f32.mrf.mxu1  ;;  %v2965_v2 = vpop.f32.mrf.mxu0 }
 0x1c7   : > { %v2576_v8 = vadd.f32 %v4759_v63, %v6241_v57  ;;  %v6340_v25 = vadd.f32 %v2965_v2, %v2570_v0 }
 0x1c8   : > { %v2515_v33 = vpop.f32.mrf.mxu1  ;;  %v4800_v21 = vpop.f32.mrf.mxu0 }
 0x1c9   : > { %v2574_v13 = vadd.f32 %v2515_v33, %v6244_v31  ;;  %v6343_v37 = vadd.f32 %v4800_v21, %v2573_v47 }
 0x1ca   : > { %v4760_v34 = vpop.f32.mrf.mxu1  ;;  %v2968_v22 = vpop.f32.mrf.mxu0 }
 0x1cb   : > { %v2577_v46 = vadd.f32 %v4760_v34, %v6247_v3  ;;  %v6346_v56 = vadd.f32 %v2968_v22, %v2571_v39 }
 0x1cc   : > { %v2518_v61 = vpop.f32.mrf.mxu1  ;;  %v4803_v41 = vpop.f32.mrf.mxu0 }
 0x1cd   : > { %v2575_v12 = vadd.f32 %v2518_v61, %v6250_v6  ;;  %v6349_v52 = vadd.f32 %v4803_v41, %v2576_v8 }
 0x1ce   : > { %v4763_v57 = vpop.f32.mrf.mxu1  ;;  %v2981_v58 = vpop.f32.mrf.mxu0 }
 0x1cf   : > { %v2580_v50 = vadd.f32 %v4763_v57, %v6253_v40  ;;  %v6352_v23 = vadd.f32 %v2981_v58, %v2574_v13 }
 0x1d0   : > { %v2531_v31 = vpop.f32.mrf.mxu1  ;;  %v4804_v35 = vpop.f32.mrf.mxu0 }
 0x1d1   : > { %v2578_v4 = vadd.f32 %v2531_v31, %v6256_v54  ;;  %v6355_v30 = vadd.f32 %v4804_v35, %v2577_v46 }
 0x1d2   : > { %v4764_v3 = vpop.f32.mrf.mxu1  ;;  %v2984_v43 = vpop.f32.mrf.mxu0 }
 0x1d3   : > { %v2581_v59 = vadd.f32 %v4764_v3, %v6259_v27  ;;  %v6358_v0 = vadd.f32 %v2984_v43, %v2575_v12 }
 0x1d4   : > { %v2534_v6 = vpop.f32.mrf.mxu1  ;;  %v4807_v48 = vpop.f32.mrf.mxu0 }
 0x1d5   : > { %v2579_v5 = vadd.f32 %v2534_v6, %v6262_v26  ;;  %v6361_v40 = vadd.f32 %v4807_v48, %v2580_v50  ;;  %v6374_v26 = vld [vmem:[%s6529_s2] ss:$0 sm:$0xff] }
 0x1d6   : > { %v4819_v47 = vpop.f32.mrf.mxu1  ;;  %v2997_v38 = vpop.f32.mrf.mxu0 }
 0x1d7   : > { %v6363_v17 = vadd.f32 %v2997_v38, %v2578_v4  ;;  %v3488_v27 = vadd.f32 %v4819_v47, %v6265_v60 }
 0x1d8   : > { %v3343_v54 = vpop.f32.mrf.mxu1  ;;  %v4808_v39 = vpop.f32.mrf.mxu0 }
 0x1d9   : > { %v6365_v63 = vadd.f32 %v4808_v39, %v2581_v59  ;;  %v3486_v34 = vadd.f32 %v3343_v54, %v6268_v62 }
 0x1da   : > { %v4820_v2 = vpop.f32.mrf.mxu1  ;;  %v3000_v8 = vpop.f32.mrf.mxu0 }
 0x1db   : > { %v6368_v33 = vadd.f32 %v3000_v8, %v2579_v5  ;;  %v3489_v41 = vadd.f32 %v4820_v2, %v6271_v29 }
 0x1dc   : > { %v3346_v21 = vpop.f32.mrf.mxu1  ;;  %v4863_v13 = vpop.f32.mrf.mxu0 }
 0x1dd   : > { %v3829_v22 = vadd.f32 %v4863_v13, %v3488_v27  ;;  %v3487_v50 = vadd.f32 %v3346_v21, %v6274_v1 }
 0x1de   : > { %v4823_v46 = vpop.f32.mrf.mxu1  ;;  %v3684_v61 = vpop.f32.mrf.mxu0 }
 0x1df   : > { %v3872_v12 = vadd.f32 %v6374_v26, %v3829_v22  ;;  %v3827_v60 = vadd.f32 %v3684_v61, %v3486_v34  ;;  %v3492_v3 = vadd.f32 %v4823_v46, %v6277_v42 }
 0x1e0   : > { %v3359_v57 = vpop.f32.mrf.mxu1  ;;  %v4864_v58 = vpop.f32.mrf.mxu0 }
 0x1e1   : > { %v3908_v62 = vmax.f32 %v3872_v12, 0.0  ;;  %v3870_v31 = vadd.f32 %v6374_v26, %v3827_v60  ;;  %v3830_v35 = vadd.f32 %v4864_v58, %v3489_v41  ;;  %v3490_v1 = vadd.f32 %v3359_v57, %v6280_v15 }
 0x1e2   : > { %v4824_v4 = vpop.f32.mrf.mxu1  ;;  %v3687_v29 = vpop.f32.mrf.mxu0 }
 0x1e3   : > { %3944 = vst.msk [vmem:[%s6382_s13 + $0x10] sm:$0xff] %vm491_vm1, %v3908_v62  ;;  %v3906_v43 = vmax.f32 %v3870_v31, 0.0  ;;  %v3873_v59 = vadd.f32 %v6374_v26, %v3830_v35  ;;  %v3828_v6 = vadd.f32 %v3687_v29, %v3487_v50  ;;  %v3493_v42 = vadd.f32 %v4824_v4, %v6283_v20 }
 0x1e4   : > { %v3362_v48 = vpop.f32.mrf.mxu1  ;;  %v4867_v5 = vpop.f32.mrf.mxu0 }
 0x1e5   : > { %3942 = vst.msk [vmem:[%s6382_s13] sm:$0xff] %vm491_vm1, %v3906_v43  ;;  %v3909_v47 = vmax.f32 %v3873_v59, 0.0  ;;  %v3871_v38 = vadd.f32 %v6374_v26, %v3828_v6  ;;  %v3833_v54 = vadd.f32 %v4867_v5, %v3492_v3  ;;  %v3491_v15 = vadd.f32 %v3362_v48, %v6286_v7 }
 0x1e6   : > { %v4827_v39 = vpop.f32.mrf.mxu1  ;;  %v3700_v2 = vpop.f32.mrf.mxu0 }
 0x1e7   : > { %3945 = vst.msk [vmem:[%s6382_s13 + $0x18] sm:$0xff] %vm491_vm1, %v3909_v47  ;;  %v3907_v8 = vmax.f32 %v3871_v38, 0.0  ;;  %v3876_v27 = vadd.f32 %v6374_v26, %v3833_v54  ;;  %v3831_v21 = vadd.f32 %v3700_v2, %v3490_v1  ;;  %v3496_v20 = vadd.f32 %v4827_v39, %v6289_v45 }
 0x1e8   : > { %v3375_v13 = vpop.f32.mrf.mxu1  ;;  %v4868_v34 = vpop.f32.mrf.mxu0 }
 0x1e9   : > { %3943 = vst.msk [vmem:[%s6382_s13 + $0x8] sm:$0xff] %vm491_vm1, %v3907_v8  ;;  %v3912_v22 = vmax.f32 %v3876_v27, 0.0  ;;  %v3874_v46 = vadd.f32 %v6374_v26, %v3831_v21  ;;  %v3834_v61 = vadd.f32 %v4868_v34, %v3493_v42  ;;  %v3494_v7 = vadd.f32 %v3375_v13, %v6292_v18 }
 0x1ea   : > { %v4828_v41 = vpop.f32.mrf.mxu1  ;;  %v3703_v12 = vpop.f32.mrf.mxu0 }
 0x1eb   : > { %3948 = vst.msk [vmem:[%s6382_s13 + $0x30] sm:$0xff] %vm491_vm1, %v3912_v22  ;;  %v3910_v60 = vmax.f32 %v3874_v46, 0.0  ;;  %v3877_v57 = vadd.f32 %v6374_v26, %v3834_v61  ;;  %v3832_v58 = vadd.f32 %v3703_v12, %v3491_v15  ;;  %v3497_v45 = vadd.f32 %v4828_v41, %v6295_v28 }
 0x1ec   : > { %v3378_v50 = vpop.f32.mrf.mxu1  ;;  %v4871_v62 = vpop.f32.mrf.mxu0 }
 0x1ed   : > { %3946 = vst.msk [vmem:[%s6382_s13 + $0x20] sm:$0xff] %vm491_vm1, %v3910_v60  ;;  %v3913_v31 = vmax.f32 %v3877_v57, 0.0  ;;  %v3875_v35 = vadd.f32 %v6374_v26, %v3832_v58  ;;  %v3837_v4 = vadd.f32 %v4871_v62, %v3496_v20  ;;  %v3495_v18 = vadd.f32 %v3378_v50, %v6298_v36 }
 0x1ee   : > { %v4831_v29 = vpop.f32.mrf.mxu1  ;;  %v3716_v3 = vpop.f32.mrf.mxu0 }
 0x1ef   : > { %3949 = vst.msk [vmem:[%s6382_s13 + $0x38] sm:$0xff] %vm491_vm1, %v3913_v31  ;;  %v3911_v43 = vmax.f32 %v3875_v35, 0.0  ;;  %v3880_v59 = vadd.f32 %v6374_v26, %v3837_v4  ;;  %v3835_v6 = vadd.f32 %v3716_v3, %v3494_v7  ;;  %v3500_v28 = vadd.f32 %v4831_v29, %v6301_v9 }
 0x1f0   : > { %v3391_v48 = vpop.f32.mrf.mxu1  ;;  %v4872_v5 = vpop.f32.mrf.mxu0 }
 0x1f1   : > { %3947 = vst.msk [vmem:[%s6382_s13 + $0x28] sm:$0xff] %vm491_vm1, %v3911_v43  ;;  %v3916_v1 = vmax.f32 %v3880_v59, 0.0  ;;  %v3878_v47 = vadd.f32 %v6374_v26, %v3835_v6  ;;  %v3838_v38 = vadd.f32 %v4872_v5, %v3497_v45  ;;  %v3498_v36 = vadd.f32 %v3391_v48, %v6304_v44 }
 0x1f2   : > { %v4832_v54 = vpop.f32.mrf.mxu1  ;;  %v3719_v39 = vpop.f32.mrf.mxu0 }
 0x1f3   : > { %3952 = vst.msk [vmem:[%s6382_s13 + $0x50] sm:$0xff] %vm491_vm1, %v3916_v1  ;;  %v3914_v2 = vmax.f32 %v3878_v47, 0.0  ;;  %v3881_v42 = vadd.f32 %v6374_v26, %v3838_v38  ;;  %v3836_v8 = vadd.f32 %v3719_v39, %v3495_v18  ;;  %v3501_v9 = vadd.f32 %v4832_v54, %v6307_v14 }
 0x1f4   : > { %v3394_v27 = vpop.f32.mrf.mxu1  ;;  %v4875_v21 = vpop.f32.mrf.mxu0 }
 0x1f5   : > { %3950 = vst.msk [vmem:[%s6382_s13 + $0x40] sm:$0xff] %vm491_vm1, %v3914_v2  ;;  %v3917_v13 = vmax.f32 %v3881_v42, 0.0  ;;  %v3879_v34 = vadd.f32 %v6374_v26, %v3836_v8  ;;  %v3841_v15 = vadd.f32 %v4875_v21, %v3500_v28  ;;  %v3499_v44 = vadd.f32 %v3394_v27, %v6310_v49 }
 0x1f6   : > { %v4835_v22 = vpop.f32.mrf.mxu1  ;;  %v3732_v46 = vpop.f32.mrf.mxu0 }
 0x1f7   : > { %3953 = vst.msk [vmem:[%s6382_s13 + $0x58] sm:$0xff] %vm491_vm1, %v3917_v13  ;;  %v3915_v61 = vmax.f32 %v3879_v34, 0.0  ;;  %v3884_v41 = vadd.f32 %v6374_v26, %v3841_v15  ;;  %v3839_v12 = vadd.f32 %v3732_v46, %v3498_v36  ;;  %v3504_v14 = vadd.f32 %v4835_v22, %v6313_v11 }
 0x1f8   : > { %v3407_v20 = vpop.f32.mrf.mxu1  ;;  %v4876_v60 = vpop.f32.mrf.mxu0 }
 0x1f9   : > { %3951 = vst.msk [vmem:[%s6382_s13 + $0x48] sm:$0xff] %vm491_vm1, %v3915_v61  ;;  %v3920_v57 = vmax.f32 %v3884_v41, 0.0  ;;  %v3882_v58 = vadd.f32 %v6374_v26, %v3839_v12  ;;  %v3842_v50 = vadd.f32 %v4876_v60, %v3501_v9  ;;  %v3502_v49 = vadd.f32 %v3407_v20, %v6316_v24 }
 0x1fa   : > { %v4836_v62 = vpop.f32.mrf.mxu1  ;;  %v3735_v7 = vpop.f32.mrf.mxu0 }
 0x1fb   : > { %3956 = vst.msk [vmem:[%s6382_s13 + $0x70] sm:$0xff] %vm491_vm1, %v3920_v57  ;;  %v3918_v31 = vmax.f32 %v3882_v58, 0.0  ;;  %v3885_v35 = vadd.f32 %v6374_v26, %v3842_v50  ;;  %v3840_v4 = vadd.f32 %v3735_v7, %v3499_v44  ;;  %v3505_v11 = vadd.f32 %v4836_v62, %v6319_v51 }
 0x1fc   : > { %v3410_v29 = vpop.f32.mrf.mxu1  ;;  %v4879_v3 = vpop.f32.mrf.mxu0 }
 0x1fd   : > { %3954 = vst.msk [vmem:[%s6382_s13 + $0x60] sm:$0xff] %vm491_vm1, %v3918_v31  ;;  %v3921_v45 = vmax.f32 %v3885_v35, 0.0  ;;  %v3883_v43 = vadd.f32 %v6374_v26, %v3840_v4  ;;  %v3845_v59 = vadd.f32 %v4879_v3, %v3504_v14  ;;  %v3503_v24 = vadd.f32 %v3410_v29, %v6322_v55 }
 0x1fe   : > { %v4839_v6 = vpop.f32.mrf.mxu1  ;;  %v3748_v48 = vpop.f32.mrf.mxu0 }
 0x1ff   : > { %3957 = vst.msk [vmem:[%s6382_s13 + $0x78] sm:$0xff] %vm491_vm1, %v3921_v45  ;;  %v3919_v5 = vmax.f32 %v3883_v43, 0.0  ;;  %v3888_v18 = vadd.f32 %v6374_v26, %v3845_v59  ;;  %v3843_v1 = vadd.f32 %v3748_v48, %v3502_v49  ;;  %v3508_v51 = vadd.f32 %v4839_v6, %v6325_v19 }
 0x200   : > { %v3423_v47 = vpop.f32.mrf.mxu1  ;;  %v4880_v38 = vpop.f32.mrf.mxu0 }
 0x201   : > { %3955 = vst.msk [vmem:[%s6382_s13 + $0x68] sm:$0xff] %vm491_vm1, %v3919_v5  ;;  %v3924_v54 = vmax.f32 %v3888_v18, 0.0  ;;  %v3886_v39 = vadd.f32 %v6374_v26, %v3843_v1  ;;  %v3846_v28 = vadd.f32 %v4880_v38, %v3505_v11  ;;  %v3506_v55 = vadd.f32 %v3423_v47, %v6328_v32 }
 0x202   : > { %v4840_v2 = vpop.f32.mrf.mxu1  ;;  %v3751_v42 = vpop.f32.mrf.mxu0 }
 0x203   : > { %3960 = vst.msk [vmem:[%s6382_s13 + $0x90] sm:$0xff] %vm491_vm1, %v3924_v54  ;;  %v3922_v8 = vmax.f32 %v3886_v39, 0.0  ;;  %v3889_v27 = vadd.f32 %v6374_v26, %v3846_v28  ;;  %v3844_v21 = vadd.f32 %v3751_v42, %v3503_v24  ;;  %v3509_v19 = vadd.f32 %v4840_v2, %v6331_v10 }
 0x204   : > { %v3426_v36 = vpop.f32.mrf.mxu1  ;;  %v4883_v13 = vpop.f32.mrf.mxu0 }
 0x205   : > { %3958 = vst.msk [vmem:[%s6382_s13 + $0x80] sm:$0xff] %vm491_vm1, %v3922_v8  ;;  %v3925_v34 = vmax.f32 %v3889_v27, 0.0  ;;  %v3887_v15 = vadd.f32 %v6374_v26, %v3844_v21  ;;  %v3849_v22 = vadd.f32 %v4883_v13, %v3508_v51  ;;  %v3507_v32 = vadd.f32 %v3426_v36, %v6334_v53 }
 0x206   : > { %v4843_v46 = vpop.f32.mrf.mxu1  ;;  %v3764_v9 = vpop.f32.mrf.mxu0 }
 0x207   : > { %3961 = vst.msk [vmem:[%s6382_s13 + $0x98] sm:$0xff] %vm491_vm1, %v3925_v34  ;;  %v3923_v61 = vmax.f32 %v3887_v15, 0.0  ;;  %v3892_v41 = vadd.f32 %v6374_v26, %v3849_v22  ;;  %v3847_v12 = vadd.f32 %v3764_v9, %v3506_v55  ;;  %v3512_v10 = vadd.f32 %v4843_v46, %v6337_v16 }
 0x208   : > { %v3439_v20 = vpop.f32.mrf.mxu1  ;;  %v4884_v60 = vpop.f32.mrf.mxu0 }
 0x209   : > { %3959 = vst.msk [vmem:[%s6382_s13 + $0x88] sm:$0xff] %vm491_vm1, %v3923_v61  ;;  %v3928_v44 = vmax.f32 %v3892_v41, 0.0  ;;  %v3890_v57 = vadd.f32 %v6374_v26, %v3847_v12  ;;  %v3850_v58 = vadd.f32 %v4884_v60, %v3509_v19  ;;  %v3510_v53 = vadd.f32 %v3439_v20, %v6340_v25 }
 0x20a   : > { %v4844_v50 = vpop.f32.mrf.mxu1  ;;  %v3767_v62 = vpop.f32.mrf.mxu0 }
 0x20b   : > { %3964 = vst.msk [vmem:[%s6382_s13 + $0xb0] sm:$0xff] %vm491_vm1, %v3928_v44  ;;  %v3926_v7 = vmax.f32 %v3890_v57, 0.0  ;;  %v3893_v14 = vadd.f32 %v6374_v26, %v3850_v58  ;;  %v3848_v31 = vadd.f32 %v3767_v62, %v3507_v32  ;;  %v3513_v16 = vadd.f32 %v4844_v50, %v6343_v37 }
 0x20c   : > { %v3442_v35 = vpop.f32.mrf.mxu1  ;;  %v4887_v4 = vpop.f32.mrf.mxu0 }
 0x20d   : > { %3962 = vst.msk [vmem:[%s6382_s13 + $0xa0] sm:$0xff] %vm491_vm1, %v3926_v7  ;;  %v3929_v29 = vmax.f32 %v3893_v14, 0.0  ;;  %v3891_v3 = vadd.f32 %v6374_v26, %v3848_v31  ;;  %v3853_v49 = vadd.f32 %v4887_v4, %v3512_v10  ;;  %v3511_v25 = vadd.f32 %v3442_v35, %v6346_v56 }
 0x20e   : > { %v4847_v45 = vpop.f32.mrf.mxu1  ;;  %v3780_v43 = vpop.f32.mrf.mxu0 }
 0x20f   : > { %3965 = vst.msk [vmem:[%s6382_s13 + $0xb8] sm:$0xff] %vm491_vm1, %v3929_v29  ;;  %v3927_v59 = vmax.f32 %v3891_v3, 0.0  ;;  %v3896_v6 = vadd.f32 %v6374_v26, %v3853_v49  ;;  %v3851_v48 = vadd.f32 %v3780_v43, %v3510_v53  ;;  %v3516_v37 = vadd.f32 %v4847_v45, %v6349_v52 }
 0x210   : > { %v3455_v11 = vpop.f32.mrf.mxu1  ;;  %v4888_v5 = vpop.f32.mrf.mxu0 }
 0x211   : > { %3963 = vst.msk [vmem:[%s6382_s13 + $0xa8] sm:$0xff] %vm491_vm1, %v3927_v59  ;;  %v3932_v18 = vmax.f32 %v3896_v6, 0.0  ;;  %v3894_v1 = vadd.f32 %v6374_v26, %v3851_v48  ;;  %v3854_v47 = vadd.f32 %v4888_v5, %v3513_v16  ;;  %v3514_v56 = vadd.f32 %v3455_v11, %v6352_v23 }
 0x212   : > { %v4848_v38 = vpop.f32.mrf.mxu1  ;;  %v3783_v24 = vpop.f32.mrf.mxu0 }
 0x213   : > { %3968 = vst.msk [vmem:[%s6382_s13 + $0xd0] sm:$0xff] %vm491_vm1, %v3932_v18  ;;  %v3930_v54 = vmax.f32 %v3894_v1, 0.0  ;;  %v3897_v39 = vadd.f32 %v6374_v26, %v3854_v47  ;;  %v3852_v28 = vadd.f32 %v3783_v24, %v3511_v25  ;;  %v3517_v52 = vadd.f32 %v4848_v38, %v6355_v30 }
 0x214   : > { %v3458_v2 = vpop.f32.mrf.mxu1  ;;  %v4891_v42 = vpop.f32.mrf.mxu0 }
 0x215   : > { %3966 = vst.msk [vmem:[%s6382_s13 + $0xc0] sm:$0xff] %vm491_vm1, %v3930_v54  ;;  %v3933_v51 = vmax.f32 %v3897_v39, 0.0  ;;  %v3895_v8 = vadd.f32 %v6374_v26, %v3852_v28  ;;  %v3857_v27 = vadd.f32 %v4891_v42, %v3516_v37  ;;  %v3515_v22 = vadd.f32 %v3458_v2, %v6358_v0 }
 0x216   : > { %v4851_v21 = vpop.f32.mrf.mxu1  ;;  %v3796_v36 = vpop.f32.mrf.mxu0 }
 0x217   : > { %3969 = vst.msk [vmem:[%s6382_s13 + $0xd8] sm:$0xff] %vm491_vm1, %v3933_v51  ;;  %v3931_v13 = vmax.f32 %v3895_v8, 0.0  ;;  %v3900_v55 = vadd.f32 %v6374_v26, %v3857_v27  ;;  %v3855_v34 = vadd.f32 %v3796_v36, %v3514_v56  ;;  %v3520_v41 = vadd.f32 %v4851_v21, %v6361_v40 }
 0x218   : > { %v3471_v15 = vpop.f32.mrf.mxu1  ;;  %v4892_v23 = vpop.f32.mrf.mxu0 }
 0x219   : > { %3967 = vst.msk [vmem:[%s6382_s13 + $0xc8] sm:$0xff] %vm491_vm1, %v3931_v13  ;;  %v3936_v46 = vmax.f32 %v3900_v55, 0.0  ;;  %v3898_v9 = vadd.f32 %v6374_v26, %v3855_v34  ;;  %v3858_v19 = vadd.f32 %v4892_v23, %v3517_v52  ;;  %v3518_v0 = vadd.f32 %v3471_v15, %v6363_v17 }
 0x21a   : > { %v4852_v61 = vpop.f32.mrf.mxu1  ;;  %v3799_v30 = vpop.f32.mrf.mxu0 }
 0x21b   : > { %3972 = vst.msk [vmem:[%s6382_s13 + $0xf0] sm:$0xff] %vm491_vm1, %v3936_v46  ;;  %v3934_v12 = vmax.f32 %v3898_v9, 0.0  ;;  %v3901_v20 = vadd.f32 %v6374_v26, %v3858_v19  ;;  %v3856_v60 = vadd.f32 %v3799_v30, %v3515_v22  ;;  %v3521_v40 = vadd.f32 %v4852_v61, %v6365_v63 }
 0x21c   : > { %v4895_v32 = vpop.f32.mrf.mxu0  ;;  %v3474_v50 = vpop.f32.mrf.mxu1 }
 0x21d   : > { %3970 = vst.msk [vmem:[%s6382_s13 + $0xe0] sm:$0xff] %vm491_vm1, %v3934_v12  ;;  %v3937_v44 = vmax.f32 %v3901_v20, 0.0  ;;  %v3899_v57 = vadd.f32 %v6374_v26, %v3856_v60  ;;  %v3861_v58 = vadd.f32 %v4895_v32, %v3520_v41  ;;  %v3519_v31 = vadd.f32 %v3474_v50, %v6368_v33 }
 0x21e   : > { %v3812_v62 = vpop.f32.mrf.mxu0 }
 0x21f   : > { %3973 = vst.msk [vmem:[%s6382_s13 + $0xf8] sm:$0xff] %vm491_vm1, %v3937_v44  ;;  %v3935_v10 = vmax.f32 %v3899_v57, 0.0  ;;  %v3904_v7 = vadd.f32 %v6374_v26, %v3861_v58  ;;  %v3859_v14 = vadd.f32 %v3812_v62, %v3518_v0 }
 0x220   : > { %v4896_v17 = vpop.f32.mrf.mxu0 }
 0x221   : > { %3971 = vst.msk [vmem:[%s6382_s13 + $0xe8] sm:$0xff] %vm491_vm1, %v3935_v10  ;;  %v3940_v35 = vmax.f32 %v3904_v7, 0.0  ;;  %v3902_v4 = vadd.f32 %v6374_v26, %v3859_v14  ;;  %v3862_v53 = vadd.f32 %v4896_v17, %v3521_v40 }
 0x222   : > { %v3815_v29 = vpop.f32.mrf.mxu0 }
 0x223   : > { %3976 = vst.msk [vmem:[%s6382_s13 + $0x110] sm:$0xff] %vm491_vm1, %v3940_v35  ;;  %v3938_v63 = vmax.f32 %v3902_v4, 0.0  ;;  %v3905_v3 = vadd.f32 %v6374_v26, %v3862_v53  ;;  %v3860_v49 = vadd.f32 %v3815_v29, %v3519_v31 }
 0x225   : > { %3974 = vst.msk [vmem:[%s6382_s13 + $0x100] sm:$0xff] %vm491_vm1, %v3938_v63  ;;  %v3941_v45 = vmax.f32 %v3905_v3, 0.0  ;;  %v3903_v43 = vadd.f32 %v6374_v26, %v3860_v49 }
 0x227   : > { %3977 = vst.msk [vmem:[%s6382_s13 + $0x118] sm:$0xff] %vm491_vm1, %v3941_v45  ;;  %v3939_v33 = vmax.f32 %v3903_v43, 0.0 }
 0x229   : > { %3975 = vst.msk [vmem:[%s6382_s13 + $0x108] sm:$0xff] %vm491_vm1, %v3939_v33 }
 0x22a PF: > { %s13_s12 = sadd.s32 1, %s5019_s12  }
 0x22b   : > { %p10_p4 = scmp.ge.s32.totalorder %s13_s12, 4  }
 0x22d   :  { %12 = sbr.rel (!%p10_p4) target bundleno = 1 (0x1), region = 62 }

</bundles_post_ra>
